<compile_context>
chip_gen: v7x
topology: tpu7x:2x2x1
jax: 0.10.0
libtpu: 0.0.40
codegen_flags: <defaults>
</compile_context>

<pallas_src>
import functools
import math

import jax
import jax.numpy as jnp
from jax import lax
from jax.experimental import pallas as pl
from jax.experimental.pallas import tpu as pltpu

D_MODEL = 64
NHEAD = 2
HEAD_DIM = D_MODEL // NHEAD
NUM_LAYERS = 2
DIM_FF = 128
VOCAB = 32
MAX_SEQ = 64
LN_EPS = 1e-5
OUT_PAD = 128                      # lane-dense padded vocab width for the final store
SMALL_W = 3 * D_MODEL              # lane width of the packed "small params" slab
SMALL_ROWS_PER_LAYER = 8           # bqkv, bo, g1, be1, bb1, bb2, g2, be2


def _vmem_spec():
    # Whole-array blocks resident in VMEM (total working set < 200 KB).
    return pl.BlockSpec(memory_space=pltpu.MemorySpace.VMEM)


def _layernorm(x, gamma, beta):
    """Two-pass LayerNorm over the last dim (matches PyTorch numerics tightly)."""
    mu = jnp.mean(x, axis=-1, keepdims=True)
    xc = x - mu
    var = jnp.mean(xc * xc, axis=-1, keepdims=True)
    return xc * lax.rsqrt(var + LN_EPS) * gamma + beta


# ---------------------------------------------------------------------------
# Fused Pallas kernel: whole TinyGPT forward
# ---------------------------------------------------------------------------
def fused_forward_kernel(tok_ref, pos_ref, emb_ref, wqkv_ref, wo_ref, w1_ref,
                         w2_ref, small_ref, wout_ref, o_ref,
                         *, batch, seq, nhead, num_layers):
    B, S = batch, seq
    BS = B * S
    V, D = emb_ref.shape
    hd = D // nhead
    ff = w1_ref.shape[-1]
    scale = 1.0 / math.sqrt(hd)

    # ---- embedding lookup as a one-hot MXU matmul + (pre-tiled) positional add ----
    tok = tok_ref[...]                                             # (BS, 1) int32
    iota = lax.broadcasted_iota(jnp.int32, (BS, V), 1)
    onehot = (iota == tok).astype(jnp.bfloat16)                    # exact 0/1 in bf16
    x = jnp.dot(onehot, emb_ref[...], preferred_element_type=jnp.float32)
    x = x + pos_ref[...]                                           # (BS, D) f32

    # ---- transformer encoder layers (post-norm, ReLU, no mask) ----
    for li in range(num_layers):
        r0 = li * SMALL_ROWS_PER_LAYER
        wqkv = wqkv_ref[li * D:(li + 1) * D, :]        # (D, 3D)  bf16
        wo = wo_ref[li * D:(li + 1) * D, :]            # (D, D)   bf16
        w1 = w1_ref[li * D:(li + 1) * D, :]            # (D, FF)  bf16
        w2 = w2_ref[li * ff:(li + 1) * ff, :]          # (FF, D)  bf16
        bqkv = small_ref[r0 + 0:r0 + 1, :]             # (1, 3D)  f32
        bo = small_ref[r0 + 1:r0 + 2, :D]
        g1 = small_ref[r0 + 2:r0 + 3, :D]
        be1 = small_ref[r0 + 3:r0 + 4, :D]
        bb1 = small_ref[r0 + 4:r0 + 5, :ff]
        bb2 = small_ref[r0 + 5:r0 + 6, :D]
        g2 = small_ref[r0 + 6:r0 + 7, :D]
        be2 = small_ref[r0 + 7:r0 + 8, :D]

        # Fused QKV projection: one MXU dot per layer (bf16 operands, f32 acc).
        qkv = jnp.dot(x.astype(jnp.bfloat16), wqkv,
                      preferred_element_type=jnp.float32) + bqkv   # (BS, 3D) f32

        # Attention: static unroll over (head, batch) -> plain 2-D dots, no
        # 3-D reshapes/einsums.  Tiny score/context dots stay in f32.
        head_ctx = []
        for h in range(nhead):
            q_h = qkv[:, h * hd:(h + 1) * hd] * scale              # (BS, hd)
            k_h = qkv[:, D + h * hd:D + (h + 1) * hd]
            v_h = qkv[:, 2 * D + h * hd:2 * D + (h + 1) * hd]
            rows = []
            for b in range(B):
                qb = q_h[b * S:(b + 1) * S, :]
                kb = k_h[b * S:(b + 1) * S, :]
                vb = v_h[b * S:(b + 1) * S, :]
                # scores = qb @ kb.T without materializing a transpose
                s = lax.dot_general(qb, kb, (((1,), (1,)), ((), ())),
                                    preferred_element_type=jnp.float32)  # (S, S)
                s = s - jnp.max(s, axis=-1, keepdims=True)
                e = jnp.exp(s)
                inv = pl.reciprocal(jnp.sum(e, axis=-1, keepdims=True), approx=True)
                p = e * inv
                rows.append(jnp.dot(p, vb, preferred_element_type=jnp.float32))
            head_ctx.append(jnp.concatenate(rows, axis=0))         # (BS, hd)
        attn_ctx = jnp.concatenate(head_ctx, axis=-1)              # (BS, D)

        # Single full-width output projection per layer.
        attn = jnp.dot(attn_ctx.astype(jnp.bfloat16), wo,
                       preferred_element_type=jnp.float32) + bo

        # residual + LayerNorm1
        x = _layernorm(x + attn, g1, be1)

        # feed-forward (ReLU)
        h1 = jnp.dot(x.astype(jnp.bfloat16), w1,
                     preferred_element_type=jnp.float32) + bb1
        h1 = jnp.maximum(h1, 0.0)
        ffo = jnp.dot(h1.astype(jnp.bfloat16), w2,
                      preferred_element_type=jnp.float32) + bb2

        # residual + LayerNorm2
        x = _layernorm(x + ffo, g2, be2)

    # ---- vocab projection, padded to 128 lanes -> unmasked lane-dense store ----
    rb = num_layers * SMALL_ROWS_PER_LAYER
    b_out = small_ref[rb:rb + 1, :OUT_PAD]                          # (1, 128) f32
    logits = jnp.dot(x.astype(jnp.bfloat16), wout_ref[...],
                     preferred_element_type=jnp.float32) + b_out
    o_ref[...] = logits.astype(o_ref.dtype)


# ---------------------------------------------------------------------------
# Wrapper
# ---------------------------------------------------------------------------
def tiny_gpt_forward(tokens, params):
    # x = x[:, :max_seq_length]
    tokens = tokens[:, :MAX_SEQ]
    B, S = tokens.shape
    BS = B * S
    tok2 = tokens.reshape(BS, 1).astype(jnp.int32)

    # Pre-tile positional embedding to (BS, D) so the kernel never reshapes
    # between (BS, D) and (B, S, D).
    pos_bs = jnp.tile(params['pos_embedding'][0, :S, :], (B, 1))    # (BS, D)

    args = (tok2, pos_bs, params['embedding'], params['wqkv'], params['wo'],
            params['w1'], params['w2'], params['small'], params['w_out_pad'])

    kernel = functools.partial(fused_forward_kernel, batch=B, seq=S,
                               nhead=NHEAD, num_layers=NUM_LAYERS)
    out = pl.pallas_call(
        kernel,
        out_shape=jax.ShapeDtypeStruct((BS, OUT_PAD), jnp.float32),
        in_specs=[_vmem_spec() for _ in args],
        out_specs=_vmem_spec(),
    )(*args)
    # Free metadata reshape + single small slice back to the real vocab width.
    # TODO(synk): cross-entropy loss branch and generate() sampling are not
    # implemented; forward returns logits only.
    return out.reshape(B, S, OUT_PAD)[:, :, :VOCAB]


# ---------------------------------------------------------------------------
# Parameter construction (packed slabs, bf16 weights)
# ---------------------------------------------------------------------------
def init_params(key):
    """Deterministic synthetic parameters matching TinyGPT's shapes, packed
    into a handful of contiguous slabs."""
    def nrm(k, shape, scale=0.02):
        return (scale * jax.random.normal(k, shape)).astype(jnp.float32)

    keys = jax.random.split(key, 4 + NUM_LAYERS)
    emb = nrm(keys[0], (VOCAB, D_MODEL))
    pos = nrm(keys[1], (1, MAX_SEQ, D_MODEL))
    w_out = nrm(keys[2], (D_MODEL, VOCAB))                 # pre-transposed (in, out)
    b_out = nrm(keys[3], (VOCAB,))

    w_out_pad = jnp.zeros((D_MODEL, OUT_PAD), jnp.float32).at[:, :VOCAB].set(w_out)

    wqkv_rows, wo_rows, w1_rows, w2_rows = [], [], [], []
    small = jnp.zeros((NUM_LAYERS * SMALL_ROWS_PER_LAYER + 1, SMALL_W), jnp.float32)
    for li in range(NUM_LAYERS):
        lk = jax.random.split(keys[4 + li], 8)
        wq = nrm(lk[0], (D_MODEL, D_MODEL))
        wk = nrm(lk[1], (D_MODEL, D_MODEL))
        wv = nrm(lk[2], (D_MODEL, D_MODEL))
        wo = nrm(lk[3], (D_MODEL, D_MODEL))
        w1 = nrm(lk[4], (D_MODEL, DIM_FF))
        w2 = nrm(lk[5], (DIM_FF, D_MODEL))
        bqkv = nrm(lk[6], (3 * D_MODEL,))
        bb1 = nrm(lk[7], (DIM_FF,))

        wqkv_rows.append(jnp.concatenate([wq, wk, wv], axis=1))   # (D, 3D)
        wo_rows.append(wo)
        w1_rows.append(w1)
        w2_rows.append(w2)

        r = li * SMALL_ROWS_PER_LAYER
        small = small.at[r + 0, :].set(bqkv)                      # [bq | bk | bv]
        # r+1: bo (zeros), r+3: LN1 beta (zeros), r+5: bb2 (zeros), r+7: LN2 beta (zeros)
        small = small.at[r + 2, :D_MODEL].set(1.0)                # LN1 gamma
        small = small.at[r + 4, :DIM_FF].set(bb1)                 # FF1 bias
        small = small.at[r + 6, :D_MODEL].set(1.0)                # LN2 gamma
    small = small.at[NUM_LAYERS * SMALL_ROWS_PER_LAYER, :VOCAB].set(b_out)

    return {
        'embedding': emb.astype(jnp.bfloat16),                          # (V, D)
        'pos_embedding': pos,                                           # (1, MAX_SEQ, D) f32
        'wqkv': jnp.concatenate(wqkv_rows, axis=0).astype(jnp.bfloat16),  # (L*D, 3D)
        'wo': jnp.concatenate(wo_rows, axis=0).astype(jnp.bfloat16),      # (L*D, D)
        'w1': jnp.concatenate(w1_rows, axis=0).astype(jnp.bfloat16),      # (L*D, FF)
        'w2': jnp.concatenate(w2_rows, axis=0).astype(jnp.bfloat16),      # (L*FF, D)
        'small': small,                                                   # (L*8+1, 192) f32
        'w_out_pad': w_out_pad.astype(jnp.bfloat16),                      # (D, 128)
    }


if __name__ == "__main__":
    key = jax.random.PRNGKey(0)
    k_tok, k_par = jax.random.split(key)

    B, S = 2, 8
    tokens = jax.random.randint(k_tok, (B, S), 0, VOCAB, dtype=jnp.int32)
    params = init_params(k_par)

    logits = jax.jit(tiny_gpt_forward)(tokens, params)
    logits = jax.block_until_ready(logits)

    assert logits.shape == (B, S, VOCAB), logits.shape
    assert bool(jnp.all(jnp.isfinite(logits)))
    print("KERNEL_OK")
</pallas_src>

<mosaic_0001>
module attributes {stable_mosaic.version = 11 : i64} {
  func.func @fused_forward_kernel(%arg0: memref<16x1xi32, #tpu.memory_space<vmem>>, %arg1: memref<16x64xf32, #tpu.memory_space<vmem>>, %arg2: memref<32x64xbf16, #tpu.memory_space<vmem>>, %arg3: memref<128x192xbf16, #tpu.memory_space<vmem>>, %arg4: memref<128x64xbf16, #tpu.memory_space<vmem>>, %arg5: memref<128x128xbf16, #tpu.memory_space<vmem>>, %arg6: memref<256x64xbf16, #tpu.memory_space<vmem>>, %arg7: memref<17x192xf32, #tpu.memory_space<vmem>>, %arg8: memref<64x128xbf16, #tpu.memory_space<vmem>>, %arg9: memref<16x128xf32, #tpu.memory_space<vmem>>) attributes {dimension_semantics = [], scalar_prefetch = 0 : i64, scratch_operands = 0 : i64, tpu.core_type = #tpu.core_type<tc>} {
    %c0 = arith.constant 0 : index
    %c0_0 = arith.constant 0 : index
    %0 = vector.load %arg0[%c0, %c0_0] : memref<16x1xi32, #tpu.memory_space<vmem>>, vector<16x1xi32>
    %1 = tpu.iota {dimensions = array<i32: 1>} : vector<16x32xi32>
    %2 = vector.broadcast %0 : vector<16x1xi32> to vector<16x32xi32>
    %3 = arith.cmpi eq, %1, %2 : vector<16x32xi32>
    %4 = arith.extui %3 : vector<16x32xi1> to vector<16x32xi32>
    %5 = arith.sitofp %4 : vector<16x32xi32> to vector<16x32xf32>
    %6 = arith.truncf %5 : vector<16x32xf32> to vector<16x32xbf16>
    %c0_1 = arith.constant 0 : index
    %c0_2 = arith.constant 0 : index
    %7 = vector.load %arg2[%c0_1, %c0_2] : memref<32x64xbf16, #tpu.memory_space<vmem>>, vector<32x64xbf16>
    %cst = arith.constant dense<0.000000e+00> : vector<16x64xf32>
    %8 = tpu.matmul %6, %7, %cst {dimension_numbers = #tpu.dot_dimension_numbers<[1], [0], [0], [1], [0, 0, 1, 1], [], []>} : vector<16x32xbf16>, vector<32x64xbf16>, vector<16x64xf32> -> vector<16x64xf32>
    %c0_3 = arith.constant 0 : index
    %c0_4 = arith.constant 0 : index
    %9 = vector.load %arg1[%c0_3, %c0_4] : memref<16x64xf32, #tpu.memory_space<vmem>>, vector<16x64xf32>
    %10 = arith.addf %8, %9 : vector<16x64xf32>
    %c0_5 = arith.constant 0 : index
    %c0_6 = arith.constant 0 : index
    %11 = vector.load %arg3[%c0_5, %c0_6] : memref<128x192xbf16, #tpu.memory_space<vmem>>, vector<64x192xbf16>
    %c0_7 = arith.constant 0 : index
    %c0_8 = arith.constant 0 : index
    %12 = vector.load %arg4[%c0_7, %c0_8] : memref<128x64xbf16, #tpu.memory_space<vmem>>, vector<64x64xbf16>
    %c0_9 = arith.constant 0 : index
    %c0_10 = arith.constant 0 : index
    %13 = vector.load %arg5[%c0_9, %c0_10] : memref<128x128xbf16, #tpu.memory_space<vmem>>, vector<64x128xbf16>
    %c0_11 = arith.constant 0 : index
    %c0_12 = arith.constant 0 : index
    %14 = vector.load %arg6[%c0_11, %c0_12] : memref<256x64xbf16, #tpu.memory_space<vmem>>, vector<128x64xbf16>
    %c0_13 = arith.constant 0 : index
    %c0_14 = arith.constant 0 : index
    %15 = vector.load %arg7[%c0_13, %c0_14] : memref<17x192xf32, #tpu.memory_space<vmem>>, vector<1x192xf32>
    %c1 = arith.constant 1 : index
    %c0_15 = arith.constant 0 : index
    %16 = vector.load %arg7[%c1, %c0_15] : memref<17x192xf32, #tpu.memory_space<vmem>>, vector<1x64xf32>
    %c2 = arith.constant 2 : index
    %c0_16 = arith.constant 0 : index
    %17 = vector.load %arg7[%c2, %c0_16] : memref<17x192xf32, #tpu.memory_space<vmem>>, vector<1x64xf32>
    %c3 = arith.constant 3 : index
    %c0_17 = arith.constant 0 : index
    %18 = vector.load %arg7[%c3, %c0_17] : memref<17x192xf32, #tpu.memory_space<vmem>>, vector<1x64xf32>
    %c4 = arith.constant 4 : index
    %c0_18 = arith.constant 0 : index
    %19 = vector.load %arg7[%c4, %c0_18] : memref<17x192xf32, #tpu.memory_space<vmem>>, vector<1x128xf32>
    %c5 = arith.constant 5 : index
    %c0_19 = arith.constant 0 : index
    %20 = vector.load %arg7[%c5, %c0_19] : memref<17x192xf32, #tpu.memory_space<vmem>>, vector<1x64xf32>
    %c6 = arith.constant 6 : index
    %c0_20 = arith.constant 0 : index
    %21 = vector.load %arg7[%c6, %c0_20] : memref<17x192xf32, #tpu.memory_space<vmem>>, vector<1x64xf32>
    %c7 = arith.constant 7 : index
    %c0_21 = arith.constant 0 : index
    %22 = vector.load %arg7[%c7, %c0_21] : memref<17x192xf32, #tpu.memory_space<vmem>>, vector<1x64xf32>
    %23 = arith.truncf %10 : vector<16x64xf32> to vector<16x64xbf16>
    %cst_22 = arith.constant dense<0.000000e+00> : vector<16x192xf32>
    %24 = tpu.matmul %23, %11, %cst_22 {dimension_numbers = #tpu.dot_dimension_numbers<[1], [0], [0], [1], [0, 0, 1, 1], [], []>} : vector<16x64xbf16>, vector<64x192xbf16>, vector<16x192xf32> -> vector<16x192xf32>
    %25 = vector.broadcast %15 : vector<1x192xf32> to vector<16x192xf32>
    %26 = arith.addf %24, %25 : vector<16x192xf32>
    %27 = vector.extract_strided_slice %26 {offsets = [0, 0], sizes = [16, 32], strides = [1, 1]} : vector<16x192xf32> to vector<16x32xf32>
    %cst_23 = arith.constant 0.176776692 : f32
    %28 = vector.broadcast %cst_23 : f32 to vector<16x32xf32>
    %29 = arith.mulf %27, %28 : vector<16x32xf32>
    %30 = vector.extract_strided_slice %26 {offsets = [0, 64], sizes = [16, 32], strides = [1, 1]} : vector<16x192xf32> to vector<16x32xf32>
    %31 = vector.extract_strided_slice %26 {offsets = [0, 128], sizes = [16, 32], strides = [1, 1]} : vector<16x192xf32> to vector<16x32xf32>
    %32 = vector.extract_strided_slice %29 {offsets = [0, 0], sizes = [8, 32], strides = [1, 1]} : vector<16x32xf32> to vector<8x32xf32>
    %33 = vector.extract_strided_slice %30 {offsets = [0, 0], sizes = [8, 32], strides = [1, 1]} : vector<16x32xf32> to vector<8x32xf32>
    %34 = vector.extract_strided_slice %31 {offsets = [0, 0], sizes = [8, 32], strides = [1, 1]} : vector<16x32xf32> to vector<8x32xf32>
    %cst_24 = arith.constant dense<0.000000e+00> : vector<8x8xf32>
    %35 = tpu.matmul %32, %33, %cst_24 {dimension_numbers = #tpu.dot_dimension_numbers<[1], [1], [0], [0], [0, 0, 1, 0], [], []>} : vector<8x32xf32>, vector<8x32xf32>, vector<8x8xf32> -> vector<8x8xf32>
    %cst_25 = arith.constant dense<0xFF800000> : vector<8xf32>
    %36 = vector.multi_reduction <maximumf>, %35, %cst_25 [1] : vector<8x8xf32> to vector<8xf32>
    %37 = vector.shape_cast %36 : vector<8xf32> to vector<8x1xf32>
    %38 = vector.broadcast %37 : vector<8x1xf32> to vector<8x8xf32>
    %39 = arith.subf %35, %38 : vector<8x8xf32>
    %40 = math.exp %39 : vector<8x8xf32>
    %cst_26 = arith.constant dense<0.000000e+00> : vector<8xf32>
    %41 = vector.multi_reduction <add>, %40, %cst_26 [1] : vector<8x8xf32> to vector<8xf32>
    %42 = vector.shape_cast %41 : vector<8xf32> to vector<8x1xf32>
    %43 = tpu.reciprocal %42 {approx = true} : vector<8x1xf32> -> vector<8x1xf32>
    %44 = vector.broadcast %43 : vector<8x1xf32> to vector<8x8xf32>
    %45 = arith.mulf %40, %44 : vector<8x8xf32>
    %cst_27 = arith.constant dense<0.000000e+00> : vector<8x32xf32>
    %46 = tpu.matmul %45, %34, %cst_27 {dimension_numbers = #tpu.dot_dimension_numbers<[1], [0], [0], [1], [0, 0, 1, 1], [], []>} : vector<8x8xf32>, vector<8x32xf32>, vector<8x32xf32> -> vector<8x32xf32>
    %47 = vector.extract_strided_slice %29 {offsets = [8, 0], sizes = [8, 32], strides = [1, 1]} : vector<16x32xf32> to vector<8x32xf32>
    %48 = vector.extract_strided_slice %30 {offsets = [8, 0], sizes = [8, 32], strides = [1, 1]} : vector<16x32xf32> to vector<8x32xf32>
    %49 = vector.extract_strided_slice %31 {offsets = [8, 0], sizes = [8, 32], strides = [1, 1]} : vector<16x32xf32> to vector<8x32xf32>
    %cst_28 = arith.constant dense<0.000000e+00> : vector<8x8xf32>
    %50 = tpu.matmul %47, %48, %cst_28 {dimension_numbers = #tpu.dot_dimension_numbers<[1], [1], [0], [0], [0, 0, 1, 0], [], []>} : vector<8x32xf32>, vector<8x32xf32>, vector<8x8xf32> -> vector<8x8xf32>
    %cst_29 = arith.constant dense<0xFF800000> : vector<8xf32>
    %51 = vector.multi_reduction <maximumf>, %50, %cst_29 [1] : vector<8x8xf32> to vector<8xf32>
    %52 = vector.shape_cast %51 : vector<8xf32> to vector<8x1xf32>
    %53 = vector.broadcast %52 : vector<8x1xf32> to vector<8x8xf32>
    %54 = arith.subf %50, %53 : vector<8x8xf32>
    %55 = math.exp %54 : vector<8x8xf32>
    %cst_30 = arith.constant dense<0.000000e+00> : vector<8xf32>
    %56 = vector.multi_reduction <add>, %55, %cst_30 [1] : vector<8x8xf32> to vector<8xf32>
    %57 = vector.shape_cast %56 : vector<8xf32> to vector<8x1xf32>
    %58 = tpu.reciprocal %57 {approx = true} : vector<8x1xf32> -> vector<8x1xf32>
    %59 = vector.broadcast %58 : vector<8x1xf32> to vector<8x8xf32>
    %60 = arith.mulf %55, %59 : vector<8x8xf32>
    %cst_31 = arith.constant dense<0.000000e+00> : vector<8x32xf32>
    %61 = tpu.matmul %60, %49, %cst_31 {dimension_numbers = #tpu.dot_dimension_numbers<[1], [0], [0], [1], [0, 0, 1, 1], [], []>} : vector<8x8xf32>, vector<8x32xf32>, vector<8x32xf32> -> vector<8x32xf32>
    %62 = tpu.concatenate %46, %61 in 0 : vector<8x32xf32>, vector<8x32xf32> -> vector<16x32xf32>
    %63 = vector.extract_strided_slice %26 {offsets = [0, 32], sizes = [16, 32], strides = [1, 1]} : vector<16x192xf32> to vector<16x32xf32>
    %cst_32 = arith.constant 0.176776692 : f32
    %64 = vector.broadcast %cst_32 : f32 to vector<16x32xf32>
    %65 = arith.mulf %63, %64 : vector<16x32xf32>
    %66 = vector.extract_strided_slice %26 {offsets = [0, 96], sizes = [16, 32], strides = [1, 1]} : vector<16x192xf32> to vector<16x32xf32>
    %67 = vector.extract_strided_slice %26 {offsets = [0, 160], sizes = [16, 32], strides = [1, 1]} : vector<16x192xf32> to vector<16x32xf32>
    %68 = vector.extract_strided_slice %65 {offsets = [0, 0], sizes = [8, 32], strides = [1, 1]} : vector<16x32xf32> to vector<8x32xf32>
    %69 = vector.extract_strided_slice %66 {offsets = [0, 0], sizes = [8, 32], strides = [1, 1]} : vector<16x32xf32> to vector<8x32xf32>
    %70 = vector.extract_strided_slice %67 {offsets = [0, 0], sizes = [8, 32], strides = [1, 1]} : vector<16x32xf32> to vector<8x32xf32>
    %cst_33 = arith.constant dense<0.000000e+00> : vector<8x8xf32>
    %71 = tpu.matmul %68, %69, %cst_33 {dimension_numbers = #tpu.dot_dimension_numbers<[1], [1], [0], [0], [0, 0, 1, 0], [], []>} : vector<8x32xf32>, vector<8x32xf32>, vector<8x8xf32> -> vector<8x8xf32>
    %cst_34 = arith.constant dense<0xFF800000> : vector<8xf32>
    %72 = vector.multi_reduction <maximumf>, %71, %cst_34 [1] : vector<8x8xf32> to vector<8xf32>
    %73 = vector.shape_cast %72 : vector<8xf32> to vector<8x1xf32>
    %74 = vector.broadcast %73 : vector<8x1xf32> to vector<8x8xf32>
    %75 = arith.subf %71, %74 : vector<8x8xf32>
    %76 = math.exp %75 : vector<8x8xf32>
    %cst_35 = arith.constant dense<0.000000e+00> : vector<8xf32>
    %77 = vector.multi_reduction <add>, %76, %cst_35 [1] : vector<8x8xf32> to vector<8xf32>
    %78 = vector.shape_cast %77 : vector<8xf32> to vector<8x1xf32>
    %79 = tpu.reciprocal %78 {approx = true} : vector<8x1xf32> -> vector<8x1xf32>
    %80 = vector.broadcast %79 : vector<8x1xf32> to vector<8x8xf32>
    %81 = arith.mulf %76, %80 : vector<8x8xf32>
    %cst_36 = arith.constant dense<0.000000e+00> : vector<8x32xf32>
    %82 = tpu.matmul %81, %70, %cst_36 {dimension_numbers = #tpu.dot_dimension_numbers<[1], [0], [0], [1], [0, 0, 1, 1], [], []>} : vector<8x8xf32>, vector<8x32xf32>, vector<8x32xf32> -> vector<8x32xf32>
    %83 = vector.extract_strided_slice %65 {offsets = [8, 0], sizes = [8, 32], strides = [1, 1]} : vector<16x32xf32> to vector<8x32xf32>
    %84 = vector.extract_strided_slice %66 {offsets = [8, 0], sizes = [8, 32], strides = [1, 1]} : vector<16x32xf32> to vector<8x32xf32>
    %85 = vector.extract_strided_slice %67 {offsets = [8, 0], sizes = [8, 32], strides = [1, 1]} : vector<16x32xf32> to vector<8x32xf32>
    %cst_37 = arith.constant dense<0.000000e+00> : vector<8x8xf32>
    %86 = tpu.matmul %83, %84, %cst_37 {dimension_numbers = #tpu.dot_dimension_numbers<[1], [1], [0], [0], [0, 0, 1, 0], [], []>} : vector<8x32xf32>, vector<8x32xf32>, vector<8x8xf32> -> vector<8x8xf32>
    %cst_38 = arith.constant dense<0xFF800000> : vector<8xf32>
    %87 = vector.multi_reduction <maximumf>, %86, %cst_38 [1] : vector<8x8xf32> to vector<8xf32>
    %88 = vector.shape_cast %87 : vector<8xf32> to vector<8x1xf32>
    %89 = vector.broadcast %88 : vector<8x1xf32> to vector<8x8xf32>
    %90 = arith.subf %86, %89 : vector<8x8xf32>
    %91 = math.exp %90 : vector<8x8xf32>
    %cst_39 = arith.constant dense<0.000000e+00> : vector<8xf32>
    %92 = vector.multi_reduction <add>, %91, %cst_39 [1] : vector<8x8xf32> to vector<8xf32>
    %93 = vector.shape_cast %92 : vector<8xf32> to vector<8x1xf32>
    %94 = tpu.reciprocal %93 {approx = true} : vector<8x1xf32> -> vector<8x1xf32>
    %95 = vector.broadcast %94 : vector<8x1xf32> to vector<8x8xf32>
    %96 = arith.mulf %91, %95 : vector<8x8xf32>
    %cst_40 = arith.constant dense<0.000000e+00> : vector<8x32xf32>
    %97 = tpu.matmul %96, %85, %cst_40 {dimension_numbers = #tpu.dot_dimension_numbers<[1], [0], [0], [1], [0, 0, 1, 1], [], []>} : vector<8x8xf32>, vector<8x32xf32>, vector<8x32xf32> -> vector<8x32xf32>
    %98 = tpu.concatenate %82, %97 in 0 : vector<8x32xf32>, vector<8x32xf32> -> vector<16x32xf32>
    %99 = tpu.concatenate %62, %98 in 1 : vector<16x32xf32>, vector<16x32xf32> -> vector<16x64xf32>
    %100 = arith.truncf %99 : vector<16x64xf32> to vector<16x64xbf16>
    %cst_41 = arith.constant dense<0.000000e+00> : vector<16x64xf32>
    %101 = tpu.matmul %100, %12, %cst_41 {dimension_numbers = #tpu.dot_dimension_numbers<[1], [0], [0], [1], [0, 0, 1, 1], [], []>} : vector<16x64xbf16>, vector<64x64xbf16>, vector<16x64xf32> -> vector<16x64xf32>
    %102 = vector.broadcast %16 : vector<1x64xf32> to vector<16x64xf32>
    %103 = arith.addf %101, %102 : vector<16x64xf32>
    %104 = arith.addf %10, %103 : vector<16x64xf32>
    %cst_42 = arith.constant dense<0.000000e+00> : vector<16xf32>
    %105 = vector.multi_reduction <add>, %104, %cst_42 [1] : vector<16x64xf32> to vector<16xf32>
    %106 = vector.shape_cast %105 : vector<16xf32> to vector<16x1xf32>
    %cst_43 = arith.constant 6.400000e+01 : f32
    %107 = vector.broadcast %cst_43 : f32 to vector<16x1xf32>
    %108 = arith.divf %106, %107 : vector<16x1xf32>
    %109 = vector.broadcast %108 : vector<16x1xf32> to vector<16x64xf32>
    %110 = arith.subf %104, %109 : vector<16x64xf32>
    %111 = arith.mulf %110, %110 : vector<16x64xf32>
    %cst_44 = arith.constant dense<0.000000e+00> : vector<16xf32>
    %112 = vector.multi_reduction <add>, %111, %cst_44 [1] : vector<16x64xf32> to vector<16xf32>
    %113 = vector.shape_cast %112 : vector<16xf32> to vector<16x1xf32>
    %cst_45 = arith.constant 6.400000e+01 : f32
    %114 = vector.broadcast %cst_45 : f32 to vector<16x1xf32>
    %115 = arith.divf %113, %114 : vector<16x1xf32>
    %cst_46 = arith.constant 9.99999974E-6 : f32
    %116 = vector.broadcast %cst_46 : f32 to vector<16x1xf32>
    %117 = arith.addf %115, %116 : vector<16x1xf32>
    %118 = math.rsqrt %117 : vector<16x1xf32>
    %119 = vector.broadcast %118 : vector<16x1xf32> to vector<16x64xf32>
    %120 = arith.mulf %110, %119 : vector<16x64xf32>
    %121 = vector.broadcast %17 : vector<1x64xf32> to vector<16x64xf32>
    %122 = arith.mulf %120, %121 : vector<16x64xf32>
    %123 = vector.broadcast %18 : vector<1x64xf32> to vector<16x64xf32>
    %124 = arith.addf %122, %123 : vector<16x64xf32>
    %125 = arith.truncf %124 : vector<16x64xf32> to vector<16x64xbf16>
    %cst_47 = arith.constant dense<0.000000e+00> : vector<16x128xf32>
    %126 = tpu.matmul %125, %13, %cst_47 {dimension_numbers = #tpu.dot_dimension_numbers<[1], [0], [0], [1], [0, 0, 1, 1], [], []>} : vector<16x64xbf16>, vector<64x128xbf16>, vector<16x128xf32> -> vector<16x128xf32>
    %127 = vector.broadcast %19 : vector<1x128xf32> to vector<16x128xf32>
    %128 = arith.addf %126, %127 : vector<16x128xf32>
    %cst_48 = arith.constant 0.000000e+00 : f32
    %129 = vector.broadcast %cst_48 : f32 to vector<16x128xf32>
    %130 = arith.maximumf %128, %129 : vector<16x128xf32>
    %131 = arith.truncf %130 : vector<16x128xf32> to vector<16x128xbf16>
    %cst_49 = arith.constant dense<0.000000e+00> : vector<16x64xf32>
    %132 = tpu.matmul %131, %14, %cst_49 {dimension_numbers = #tpu.dot_dimension_numbers<[1], [0], [0], [1], [0, 0, 1, 1], [], []>} : vector<16x128xbf16>, vector<128x64xbf16>, vector<16x64xf32> -> vector<16x64xf32>
    %133 = vector.broadcast %20 : vector<1x64xf32> to vector<16x64xf32>
    %134 = arith.addf %132, %133 : vector<16x64xf32>
    %135 = arith.addf %124, %134 : vector<16x64xf32>
    %cst_50 = arith.constant dense<0.000000e+00> : vector<16xf32>
    %136 = vector.multi_reduction <add>, %135, %cst_50 [1] : vector<16x64xf32> to vector<16xf32>
    %137 = vector.shape_cast %136 : vector<16xf32> to vector<16x1xf32>
    %cst_51 = arith.constant 6.400000e+01 : f32
    %138 = vector.broadcast %cst_51 : f32 to vector<16x1xf32>
    %139 = arith.divf %137, %138 : vector<16x1xf32>
    %140 = vector.broadcast %139 : vector<16x1xf32> to vector<16x64xf32>
    %141 = arith.subf %135, %140 : vector<16x64xf32>
    %142 = arith.mulf %141, %141 : vector<16x64xf32>
    %cst_52 = arith.constant dense<0.000000e+00> : vector<16xf32>
    %143 = vector.multi_reduction <add>, %142, %cst_52 [1] : vector<16x64xf32> to vector<16xf32>
    %144 = vector.shape_cast %143 : vector<16xf32> to vector<16x1xf32>
    %cst_53 = arith.constant 6.400000e+01 : f32
    %145 = vector.broadcast %cst_53 : f32 to vector<16x1xf32>
    %146 = arith.divf %144, %145 : vector<16x1xf32>
    %cst_54 = arith.constant 9.99999974E-6 : f32
    %147 = vector.broadcast %cst_54 : f32 to vector<16x1xf32>
    %148 = arith.addf %146, %147 : vector<16x1xf32>
    %149 = math.rsqrt %148 : vector<16x1xf32>
    %150 = vector.broadcast %149 : vector<16x1xf32> to vector<16x64xf32>
    %151 = arith.mulf %141, %150 : vector<16x64xf32>
    %152 = vector.broadcast %21 : vector<1x64xf32> to vector<16x64xf32>
    %153 = arith.mulf %151, %152 : vector<16x64xf32>
    %154 = vector.broadcast %22 : vector<1x64xf32> to vector<16x64xf32>
    %155 = arith.addf %153, %154 : vector<16x64xf32>
    %c64 = arith.constant 64 : index
    %c0_55 = arith.constant 0 : index
    %156 = vector.load %arg3[%c64, %c0_55] : memref<128x192xbf16, #tpu.memory_space<vmem>>, vector<64x192xbf16>
    %c64_56 = arith.constant 64 : index
    %c0_57 = arith.constant 0 : index
    %157 = vector.load %arg4[%c64_56, %c0_57] : memref<128x64xbf16, #tpu.memory_space<vmem>>, vector<64x64xbf16>
    %c64_58 = arith.constant 64 : index
    %c0_59 = arith.constant 0 : index
    %158 = vector.load %arg5[%c64_58, %c0_59] : memref<128x128xbf16, #tpu.memory_space<vmem>>, vector<64x128xbf16>
    %c128 = arith.constant 128 : index
    %c0_60 = arith.constant 0 : index
    %159 = vector.load %arg6[%c128, %c0_60] : memref<256x64xbf16, #tpu.memory_space<vmem>>, vector<128x64xbf16>
    %c8 = arith.constant 8 : index
    %c0_61 = arith.constant 0 : index
    %160 = vector.load %arg7[%c8, %c0_61] : memref<17x192xf32, #tpu.memory_space<vmem>>, vector<1x192xf32>
    %c9 = arith.constant 9 : index
    %c0_62 = arith.constant 0 : index
    %161 = vector.load %arg7[%c9, %c0_62] : memref<17x192xf32, #tpu.memory_space<vmem>>, vector<1x64xf32>
    %c10 = arith.constant 10 : index
    %c0_63 = arith.constant 0 : index
    %162 = vector.load %arg7[%c10, %c0_63] : memref<17x192xf32, #tpu.memory_space<vmem>>, vector<1x64xf32>
    %c11 = arith.constant 11 : index
    %c0_64 = arith.constant 0 : index
    %163 = vector.load %arg7[%c11, %c0_64] : memref<17x192xf32, #tpu.memory_space<vmem>>, vector<1x64xf32>
    %c12 = arith.constant 12 : index
    %c0_65 = arith.constant 0 : index
    %164 = vector.load %arg7[%c12, %c0_65] : memref<17x192xf32, #tpu.memory_space<vmem>>, vector<1x128xf32>
    %c13 = arith.constant 13 : index
    %c0_66 = arith.constant 0 : index
    %165 = vector.load %arg7[%c13, %c0_66] : memref<17x192xf32, #tpu.memory_space<vmem>>, vector<1x64xf32>
    %c14 = arith.constant 14 : index
    %c0_67 = arith.constant 0 : index
    %166 = vector.load %arg7[%c14, %c0_67] : memref<17x192xf32, #tpu.memory_space<vmem>>, vector<1x64xf32>
    %c15 = arith.constant 15 : index
    %c0_68 = arith.constant 0 : index
    %167 = vector.load %arg7[%c15, %c0_68] : memref<17x192xf32, #tpu.memory_space<vmem>>, vector<1x64xf32>
    %168 = arith.truncf %155 : vector<16x64xf32> to vector<16x64xbf16>
    %cst_69 = arith.constant dense<0.000000e+00> : vector<16x192xf32>
    %169 = tpu.matmul %168, %156, %cst_69 {dimension_numbers = #tpu.dot_dimension_numbers<[1], [0], [0], [1], [0, 0, 1, 1], [], []>} : vector<16x64xbf16>, vector<64x192xbf16>, vector<16x192xf32> -> vector<16x192xf32>
    %170 = vector.broadcast %160 : vector<1x192xf32> to vector<16x192xf32>
    %171 = arith.addf %169, %170 : vector<16x192xf32>
    %172 = vector.extract_strided_slice %171 {offsets = [0, 0], sizes = [16, 32], strides = [1, 1]} : vector<16x192xf32> to vector<16x32xf32>
    %cst_70 = arith.constant 0.176776692 : f32
    %173 = vector.broadcast %cst_70 : f32 to vector<16x32xf32>
    %174 = arith.mulf %172, %173 : vector<16x32xf32>
    %175 = vector.extract_strided_slice %171 {offsets = [0, 64], sizes = [16, 32], strides = [1, 1]} : vector<16x192xf32> to vector<16x32xf32>
    %176 = vector.extract_strided_slice %171 {offsets = [0, 128], sizes = [16, 32], strides = [1, 1]} : vector<16x192xf32> to vector<16x32xf32>
    %177 = vector.extract_strided_slice %174 {offsets = [0, 0], sizes = [8, 32], strides = [1, 1]} : vector<16x32xf32> to vector<8x32xf32>
    %178 = vector.extract_strided_slice %175 {offsets = [0, 0], sizes = [8, 32], strides = [1, 1]} : vector<16x32xf32> to vector<8x32xf32>
    %179 = vector.extract_strided_slice %176 {offsets = [0, 0], sizes = [8, 32], strides = [1, 1]} : vector<16x32xf32> to vector<8x32xf32>
    %cst_71 = arith.constant dense<0.000000e+00> : vector<8x8xf32>
    %180 = tpu.matmul %177, %178, %cst_71 {dimension_numbers = #tpu.dot_dimension_numbers<[1], [1], [0], [0], [0, 0, 1, 0], [], []>} : vector<8x32xf32>, vector<8x32xf32>, vector<8x8xf32> -> vector<8x8xf32>
    %cst_72 = arith.constant dense<0xFF800000> : vector<8xf32>
    %181 = vector.multi_reduction <maximumf>, %180, %cst_72 [1] : vector<8x8xf32> to vector<8xf32>
    %182 = vector.shape_cast %181 : vector<8xf32> to vector<8x1xf32>
    %183 = vector.broadcast %182 : vector<8x1xf32> to vector<8x8xf32>
    %184 = arith.subf %180, %183 : vector<8x8xf32>
    %185 = math.exp %184 : vector<8x8xf32>
    %cst_73 = arith.constant dense<0.000000e+00> : vector<8xf32>
    %186 = vector.multi_reduction <add>, %185, %cst_73 [1] : vector<8x8xf32> to vector<8xf32>
    %187 = vector.shape_cast %186 : vector<8xf32> to vector<8x1xf32>
    %188 = tpu.reciprocal %187 {approx = true} : vector<8x1xf32> -> vector<8x1xf32>
    %189 = vector.broadcast %188 : vector<8x1xf32> to vector<8x8xf32>
    %190 = arith.mulf %185, %189 : vector<8x8xf32>
    %cst_74 = arith.constant dense<0.000000e+00> : vector<8x32xf32>
    %191 = tpu.matmul %190, %179, %cst_74 {dimension_numbers = #tpu.dot_dimension_numbers<[1], [0], [0], [1], [0, 0, 1, 1], [], []>} : vector<8x8xf32>, vector<8x32xf32>, vector<8x32xf32> -> vector<8x32xf32>
    %192 = vector.extract_strided_slice %174 {offsets = [8, 0], sizes = [8, 32], strides = [1, 1]} : vector<16x32xf32> to vector<8x32xf32>
    %193 = vector.extract_strided_slice %175 {offsets = [8, 0], sizes = [8, 32], strides = [1, 1]} : vector<16x32xf32> to vector<8x32xf32>
    %194 = vector.extract_strided_slice %176 {offsets = [8, 0], sizes = [8, 32], strides = [1, 1]} : vector<16x32xf32> to vector<8x32xf32>
    %cst_75 = arith.constant dense<0.000000e+00> : vector<8x8xf32>
    %195 = tpu.matmul %192, %193, %cst_75 {dimension_numbers = #tpu.dot_dimension_numbers<[1], [1], [0], [0], [0, 0, 1, 0], [], []>} : vector<8x32xf32>, vector<8x32xf32>, vector<8x8xf32> -> vector<8x8xf32>
    %cst_76 = arith.constant dense<0xFF800000> : vector<8xf32>
    %196 = vector.multi_reduction <maximumf>, %195, %cst_76 [1] : vector<8x8xf32> to vector<8xf32>
    %197 = vector.shape_cast %196 : vector<8xf32> to vector<8x1xf32>
    %198 = vector.broadcast %197 : vector<8x1xf32> to vector<8x8xf32>
    %199 = arith.subf %195, %198 : vector<8x8xf32>
    %200 = math.exp %199 : vector<8x8xf32>
    %cst_77 = arith.constant dense<0.000000e+00> : vector<8xf32>
    %201 = vector.multi_reduction <add>, %200, %cst_77 [1] : vector<8x8xf32> to vector<8xf32>
    %202 = vector.shape_cast %201 : vector<8xf32> to vector<8x1xf32>
    %203 = tpu.reciprocal %202 {approx = true} : vector<8x1xf32> -> vector<8x1xf32>
    %204 = vector.broadcast %203 : vector<8x1xf32> to vector<8x8xf32>
    %205 = arith.mulf %200, %204 : vector<8x8xf32>
    %cst_78 = arith.constant dense<0.000000e+00> : vector<8x32xf32>
    %206 = tpu.matmul %205, %194, %cst_78 {dimension_numbers = #tpu.dot_dimension_numbers<[1], [0], [0], [1], [0, 0, 1, 1], [], []>} : vector<8x8xf32>, vector<8x32xf32>, vector<8x32xf32> -> vector<8x32xf32>
    %207 = tpu.concatenate %191, %206 in 0 : vector<8x32xf32>, vector<8x32xf32> -> vector<16x32xf32>
    %208 = vector.extract_strided_slice %171 {offsets = [0, 32], sizes = [16, 32], strides = [1, 1]} : vector<16x192xf32> to vector<16x32xf32>
    %cst_79 = arith.constant 0.176776692 : f32
    %209 = vector.broadcast %cst_79 : f32 to vector<16x32xf32>
    %210 = arith.mulf %208, %209 : vector<16x32xf32>
    %211 = vector.extract_strided_slice %171 {offsets = [0, 96], sizes = [16, 32], strides = [1, 1]} : vector<16x192xf32> to vector<16x32xf32>
    %212 = vector.extract_strided_slice %171 {offsets = [0, 160], sizes = [16, 32], strides = [1, 1]} : vector<16x192xf32> to vector<16x32xf32>
    %213 = vector.extract_strided_slice %210 {offsets = [0, 0], sizes = [8, 32], strides = [1, 1]} : vector<16x32xf32> to vector<8x32xf32>
    %214 = vector.extract_strided_slice %211 {offsets = [0, 0], sizes = [8, 32], strides = [1, 1]} : vector<16x32xf32> to vector<8x32xf32>
    %215 = vector.extract_strided_slice %212 {offsets = [0, 0], sizes = [8, 32], strides = [1, 1]} : vector<16x32xf32> to vector<8x32xf32>
    %cst_80 = arith.constant dense<0.000000e+00> : vector<8x8xf32>
    %216 = tpu.matmul %213, %214, %cst_80 {dimension_numbers = #tpu.dot_dimension_numbers<[1], [1], [0], [0], [0, 0, 1, 0], [], []>} : vector<8x32xf32>, vector<8x32xf32>, vector<8x8xf32> -> vector<8x8xf32>
    %cst_81 = arith.constant dense<0xFF800000> : vector<8xf32>
    %217 = vector.multi_reduction <maximumf>, %216, %cst_81 [1] : vector<8x8xf32> to vector<8xf32>
    %218 = vector.shape_cast %217 : vector<8xf32> to vector<8x1xf32>
    %219 = vector.broadcast %218 : vector<8x1xf32> to vector<8x8xf32>
    %220 = arith.subf %216, %219 : vector<8x8xf32>
    %221 = math.exp %220 : vector<8x8xf32>
    %cst_82 = arith.constant dense<0.000000e+00> : vector<8xf32>
    %222 = vector.multi_reduction <add>, %221, %cst_82 [1] : vector<8x8xf32> to vector<8xf32>
    %223 = vector.shape_cast %222 : vector<8xf32> to vector<8x1xf32>
    %224 = tpu.reciprocal %223 {approx = true} : vector<8x1xf32> -> vector<8x1xf32>
    %225 = vector.broadcast %224 : vector<8x1xf32> to vector<8x8xf32>
    %226 = arith.mulf %221, %225 : vector<8x8xf32>
    %cst_83 = arith.constant dense<0.000000e+00> : vector<8x32xf32>
    %227 = tpu.matmul %226, %215, %cst_83 {dimension_numbers = #tpu.dot_dimension_numbers<[1], [0], [0], [1], [0, 0, 1, 1], [], []>} : vector<8x8xf32>, vector<8x32xf32>, vector<8x32xf32> -> vector<8x32xf32>
    %228 = vector.extract_strided_slice %210 {offsets = [8, 0], sizes = [8, 32], strides = [1, 1]} : vector<16x32xf32> to vector<8x32xf32>
    %229 = vector.extract_strided_slice %211 {offsets = [8, 0], sizes = [8, 32], strides = [1, 1]} : vector<16x32xf32> to vector<8x32xf32>
    %230 = vector.extract_strided_slice %212 {offsets = [8, 0], sizes = [8, 32], strides = [1, 1]} : vector<16x32xf32> to vector<8x32xf32>
    %cst_84 = arith.constant dense<0.000000e+00> : vector<8x8xf32>
    %231 = tpu.matmul %228, %229, %cst_84 {dimension_numbers = #tpu.dot_dimension_numbers<[1], [1], [0], [0], [0, 0, 1, 0], [], []>} : vector<8x32xf32>, vector<8x32xf32>, vector<8x8xf32> -> vector<8x8xf32>
    %cst_85 = arith.constant dense<0xFF800000> : vector<8xf32>
    %232 = vector.multi_reduction <maximumf>, %231, %cst_85 [1] : vector<8x8xf32> to vector<8xf32>
    %233 = vector.shape_cast %232 : vector<8xf32> to vector<8x1xf32>
    %234 = vector.broadcast %233 : vector<8x1xf32> to vector<8x8xf32>
    %235 = arith.subf %231, %234 : vector<8x8xf32>
    %236 = math.exp %235 : vector<8x8xf32>
    %cst_86 = arith.constant dense<0.000000e+00> : vector<8xf32>
    %237 = vector.multi_reduction <add>, %236, %cst_86 [1] : vector<8x8xf32> to vector<8xf32>
    %238 = vector.shape_cast %237 : vector<8xf32> to vector<8x1xf32>
    %239 = tpu.reciprocal %238 {approx = true} : vector<8x1xf32> -> vector<8x1xf32>
    %240 = vector.broadcast %239 : vector<8x1xf32> to vector<8x8xf32>
    %241 = arith.mulf %236, %240 : vector<8x8xf32>
    %cst_87 = arith.constant dense<0.000000e+00> : vector<8x32xf32>
    %242 = tpu.matmul %241, %230, %cst_87 {dimension_numbers = #tpu.dot_dimension_numbers<[1], [0], [0], [1], [0, 0, 1, 1], [], []>} : vector<8x8xf32>, vector<8x32xf32>, vector<8x32xf32> -> vector<8x32xf32>
    %243 = tpu.concatenate %227, %242 in 0 : vector<8x32xf32>, vector<8x32xf32> -> vector<16x32xf32>
    %244 = tpu.concatenate %207, %243 in 1 : vector<16x32xf32>, vector<16x32xf32> -> vector<16x64xf32>
    %245 = arith.truncf %244 : vector<16x64xf32> to vector<16x64xbf16>
    %cst_88 = arith.constant dense<0.000000e+00> : vector<16x64xf32>
    %246 = tpu.matmul %245, %157, %cst_88 {dimension_numbers = #tpu.dot_dimension_numbers<[1], [0], [0], [1], [0, 0, 1, 1], [], []>} : vector<16x64xbf16>, vector<64x64xbf16>, vector<16x64xf32> -> vector<16x64xf32>
    %247 = vector.broadcast %161 : vector<1x64xf32> to vector<16x64xf32>
    %248 = arith.addf %246, %247 : vector<16x64xf32>
    %249 = arith.addf %155, %248 : vector<16x64xf32>
    %cst_89 = arith.constant dense<0.000000e+00> : vector<16xf32>
    %250 = vector.multi_reduction <add>, %249, %cst_89 [1] : vector<16x64xf32> to vector<16xf32>
    %251 = vector.shape_cast %250 : vector<16xf32> to vector<16x1xf32>
    %cst_90 = arith.constant 6.400000e+01 : f32
    %252 = vector.broadcast %cst_90 : f32 to vector<16x1xf32>
    %253 = arith.divf %251, %252 : vector<16x1xf32>
    %254 = vector.broadcast %253 : vector<16x1xf32> to vector<16x64xf32>
    %255 = arith.subf %249, %254 : vector<16x64xf32>
    %256 = arith.mulf %255, %255 : vector<16x64xf32>
    %cst_91 = arith.constant dense<0.000000e+00> : vector<16xf32>
    %257 = vector.multi_reduction <add>, %256, %cst_91 [1] : vector<16x64xf32> to vector<16xf32>
    %258 = vector.shape_cast %257 : vector<16xf32> to vector<16x1xf32>
    %cst_92 = arith.constant 6.400000e+01 : f32
    %259 = vector.broadcast %cst_92 : f32 to vector<16x1xf32>
    %260 = arith.divf %258, %259 : vector<16x1xf32>
    %cst_93 = arith.constant 9.99999974E-6 : f32
    %261 = vector.broadcast %cst_93 : f32 to vector<16x1xf32>
    %262 = arith.addf %260, %261 : vector<16x1xf32>
    %263 = math.rsqrt %262 : vector<16x1xf32>
    %264 = vector.broadcast %263 : vector<16x1xf32> to vector<16x64xf32>
    %265 = arith.mulf %255, %264 : vector<16x64xf32>
    %266 = vector.broadcast %162 : vector<1x64xf32> to vector<16x64xf32>
    %267 = arith.mulf %265, %266 : vector<16x64xf32>
    %268 = vector.broadcast %163 : vector<1x64xf32> to vector<16x64xf32>
    %269 = arith.addf %267, %268 : vector<16x64xf32>
    %270 = arith.truncf %269 : vector<16x64xf32> to vector<16x64xbf16>
    %cst_94 = arith.constant dense<0.000000e+00> : vector<16x128xf32>
    %271 = tpu.matmul %270, %158, %cst_94 {dimension_numbers = #tpu.dot_dimension_numbers<[1], [0], [0], [1], [0, 0, 1, 1], [], []>} : vector<16x64xbf16>, vector<64x128xbf16>, vector<16x128xf32> -> vector<16x128xf32>
    %272 = vector.broadcast %164 : vector<1x128xf32> to vector<16x128xf32>
    %273 = arith.addf %271, %272 : vector<16x128xf32>
    %cst_95 = arith.constant 0.000000e+00 : f32
    %274 = vector.broadcast %cst_95 : f32 to vector<16x128xf32>
    %275 = arith.maximumf %273, %274 : vector<16x128xf32>
    %276 = arith.truncf %275 : vector<16x128xf32> to vector<16x128xbf16>
    %cst_96 = arith.constant dense<0.000000e+00> : vector<16x64xf32>
    %277 = tpu.matmul %276, %159, %cst_96 {dimension_numbers = #tpu.dot_dimension_numbers<[1], [0], [0], [1], [0, 0, 1, 1], [], []>} : vector<16x128xbf16>, vector<128x64xbf16>, vector<16x64xf32> -> vector<16x64xf32>
    %278 = vector.broadcast %165 : vector<1x64xf32> to vector<16x64xf32>
    %279 = arith.addf %277, %278 : vector<16x64xf32>
    %280 = arith.addf %269, %279 : vector<16x64xf32>
    %cst_97 = arith.constant dense<0.000000e+00> : vector<16xf32>
    %281 = vector.multi_reduction <add>, %280, %cst_97 [1] : vector<16x64xf32> to vector<16xf32>
    %282 = vector.shape_cast %281 : vector<16xf32> to vector<16x1xf32>
    %cst_98 = arith.constant 6.400000e+01 : f32
    %283 = vector.broadcast %cst_98 : f32 to vector<16x1xf32>
    %284 = arith.divf %282, %283 : vector<16x1xf32>
    %285 = vector.broadcast %284 : vector<16x1xf32> to vector<16x64xf32>
    %286 = arith.subf %280, %285 : vector<16x64xf32>
    %287 = arith.mulf %286, %286 : vector<16x64xf32>
    %cst_99 = arith.constant dense<0.000000e+00> : vector<16xf32>
    %288 = vector.multi_reduction <add>, %287, %cst_99 [1] : vector<16x64xf32> to vector<16xf32>
    %289 = vector.shape_cast %288 : vector<16xf32> to vector<16x1xf32>
    %cst_100 = arith.constant 6.400000e+01 : f32
    %290 = vector.broadcast %cst_100 : f32 to vector<16x1xf32>
    %291 = arith.divf %289, %290 : vector<16x1xf32>
    %cst_101 = arith.constant 9.99999974E-6 : f32
    %292 = vector.broadcast %cst_101 : f32 to vector<16x1xf32>
    %293 = arith.addf %291, %292 : vector<16x1xf32>
    %294 = math.rsqrt %293 : vector<16x1xf32>
    %295 = vector.broadcast %294 : vector<16x1xf32> to vector<16x64xf32>
    %296 = arith.mulf %286, %295 : vector<16x64xf32>
    %297 = vector.broadcast %166 : vector<1x64xf32> to vector<16x64xf32>
    %298 = arith.mulf %296, %297 : vector<16x64xf32>
    %299 = vector.broadcast %167 : vector<1x64xf32> to vector<16x64xf32>
    %300 = arith.addf %298, %299 : vector<16x64xf32>
    %c16 = arith.constant 16 : index
    %c0_102 = arith.constant 0 : index
    %301 = vector.load %arg7[%c16, %c0_102] : memref<17x192xf32, #tpu.memory_space<vmem>>, vector<1x128xf32>
    %302 = arith.truncf %300 : vector<16x64xf32> to vector<16x64xbf16>
    %c0_103 = arith.constant 0 : index
    %c0_104 = arith.constant 0 : index
    %303 = vector.load %arg8[%c0_103, %c0_104] : memref<64x128xbf16, #tpu.memory_space<vmem>>, vector<64x128xbf16>
    %cst_105 = arith.constant dense<0.000000e+00> : vector<16x128xf32>
    %304 = tpu.matmul %302, %303, %cst_105 {dimension_numbers = #tpu.dot_dimension_numbers<[1], [0], [0], [1], [0, 0, 1, 1], [], []>} : vector<16x64xbf16>, vector<64x128xbf16>, vector<16x128xf32> -> vector<16x128xf32>
    %305 = vector.broadcast %301 : vector<1x128xf32> to vector<16x128xf32>
    %306 = arith.addf %304, %305 : vector<16x128xf32>
    %c0_106 = arith.constant 0 : index
    %c0_107 = arith.constant 0 : index
    %307 = vector.load %arg9[%c0_106, %c0_107] : memref<16x128xf32, #tpu.memory_space<vmem>>, vector<16x128xf32>
    tpu.vector_store %arg9[%c0_106, %c0_107], %306 {strides = array<i32>} : memref<16x128xf32, #tpu.memory_space<vmem>>, vector<16x128xf32>,
    return
  }
}

</mosaic_0001>

<bundles_post_ra>
// kernel: tiny_gpt_forward.1
= control target key start
LH: loop header
LB: loop body
LE: loop exit
PB: predicated region body
PF: predicated region fallthrough
CT: control target
= control target key end

     0   :  { %v2939_v1 = vmov 0   ;;  %v2940_v3 = vmov 0.0   ;;  %vm2941_vm0 = vmmov 0   ;;  %s3478_s0 = inlined_call_operand.vmem [shape: s32[16,1], index: 0, kind: input, shape index: {}]   ;;  %s3479_s1 = inlined_call_operand.vmem [shape: f32[16,64], index: 1, kind: input, shape index: {}]   ;;  %s3480_s2 = inlined_call_operand.vmem [shape: bf16[32,64], index: 2, kind: input, shape index: {}]   ;;  %s3481_s3 = inlined_call_operand.vmem [shape: bf16[128,192], index: 3, kind: input, shape index: {}]   ;;  %s3482_s4 = inlined_call_operand.vmem [shape: bf16[128,64], index: 4, kind: input, shape index: {}]   ;;  %s3483_s5 = inlined_call_operand.vmem [shape: bf16[128,128], index: 5, kind: input, shape index: {}]   ;;  %s3484_s6 = inlined_call_operand.vmem [shape: bf16[256,64], index: 6, kind: input, shape index: {}]   ;;  %s3485_s7 = inlined_call_operand.vmem [shape: f32[17,192], index: 7, kind: input, shape index: {}]   ;;  %s3486_s8 = inlined_call_operand.vmem [shape: bf16[64,128], index: 8, kind: input, shape index: {}]   ;;  %s3487_s9 = inlined_call_operand.hbm [shape: f32[16,128], index: 9, kind: output, shape index: {}]  }
   0x1   :  { %v34_v0 = vld [vmem:[%s3478_s0] sm:$0xff]  ;;  %2794 = vset.pattern.permute.xlu0 %v2939_v1  ;;  %v35_v2 = vld [vmem:[%s3478_s0 + $0x8] sm:$0xff]  ;;  %2597 = vmatprep.subr.bf16.mxu1 %v2940_v3 }
   0x2   :  { %v2805_v4 = vld [vmem:[%s3480_s2] sm:$0xff]   ;;  %39 = vperm.xlu0 %2794, %v34_v0   ;;  %2605 = vmatprep.subr.mxu0 %v2940_v3  ;;  %v2806_v5 = vld [vmem:[%s3480_s2 + $0x8] sm:$0xff]  }
   0x3   :  { %2598 = vmatpush3.bf16.msra.mxu1 %v2805_v4  ;;  %2601 = vmatprep.mubr.msk.bf16.mxu1 %vm2941_vm0, %v2940_v3  ;;  %v2809_v6 = vld [vmem:[%s3481_s3 + $0x4] ss:$8 sps:$4 sm:$0xff]  }
   0x4   :  { %2599 = vmatprep.subr.bf16.mxu1 %v2940_v3  ;;  %2607 = vmatprep.mubr.msk.f32.mxu0 %vm2941_vm0, %v2940_v3 }
   0x6   :  { %42 = vperm.xlu0 %2794, %v35_v2  }
   0x7   :  { %2600 = vmatpush3.bf16.msra.mxu1 %v2806_v5 }
   0x8   :  { %218 = vmatprep.subr.bf16.mxu1 %v2809_v6 }
   0x9   :  { %14 = vsyncpa [#allocation3], 0  ;;  %v36_v7 = vlaneseq  ;;  %vm69_vm3 = vcmask 261120   ;;  %v2807_v13 = vld [vmem:[%s3481_s3] ss:$8 sps:$4 sm:$0xff]   ;;  %vm214_vm4 = vcmask 523264  }
   0xa   :  { %v2812_v15 = vld [vmem:[%s3481_s3 + $0x14] ss:$8 sps:$4 sm:$0xff]   ;;  %v2810_v16 = vld [vmem:[%s3481_s3 + $0x10] ss:$8 sps:$4 sm:$0xff]   ;;  %v2815_v17 = vld [vmem:[%s3481_s3 + $0x24] ss:$8 sps:$4 sm:$0xff]  }
   0xb   :  { %v37_v8 = vand.u32 127, %v36_v7  ;;  %v2813_v18 = vld [vmem:[%s3481_s3 + $0x20] ss:$8 sps:$4 sm:$0xff]   ;;  %v2818_v19 = vld [vmem:[%s3481_s3 + $0x34] ss:$8 sps:$4 sm:$0xff]   ;;  %v3062_v30 = vshrl.u32 %v36_v7, 7 }
   0xc   :  { %v2816_v20 = vld [vmem:[%s3481_s3 + $0x30] ss:$8 sps:$4 sm:$0xff]   ;;  %v55_v21 = vld [vmem:[%s3479_s1] sm:$0xff]  ;;  %v56_v23 = vld [vmem:[%s3479_s1 + $0x8] sm:$0xff]  ;;  %s2942_s15 = smov 64   ;;  %vm341_vm5 = vcmask 64512  }
   0xd   :  { %v166_v31 = vsub.s32 0, %v3062_v30  ;;  %v154_v32 = vld [vmem:[%s3485_s7] ss:$8 sm:$0x3]  ;;  %v170_v33 = vsub.s32 1, %v3062_v30  ;;  %s2943_s16 = smov 32  }
   0xe   :  { %s2944_s0 = smov 96  }
   0xf   :  { %v167_v34 = vrot.slane %v154_v32, %v166_v31  ;;  %v171_v35 = vrot.slane %v154_v32, %v170_v33 }
  0x81   :  { %v40_v9 = vpop.permute.xlu0 %39 }
  0x82   :  { %vm44_vm1 = vcmp.eq.s32.totalorder %v37_v8, %v40_v9 }
  0x83   :  { %v2430_v11 = vsel %vm44_vm1, 1.0, %v2940_v3 }
  0x85   :  { %v43_v10 = vpop.permute.xlu0 %42 }
  0x86   :  { %vm45_vm2 = vcmp.eq.s32.totalorder %v37_v8, %v43_v10 }
  0x87   :  { %v2431_v12 = vsel %vm45_vm2, 1.0, %v2940_v3 }
  0x88   :  { %v50_v14 = vpack.c.bf16 %v2431_v12, %v2430_v11 }
  0x8a   :  { %2602 = vmatmul.mubr.msk.bf16.vlgmr.msra.gmra.mrb[0].mxu1 %vm69_vm3, %v50_v14 }
  0x8b   :  { %219 = vmatpush1.bf16.msra.mxu1 %v2807_v13  ;;  %250 = vmatprep.mubr.bf16.mxu1 %v2939_v1 }
  0x8c   :  { %220 = vmatprep.subr.bf16.mxu1 %v2812_v15 }
  0x8f   :  { %221 = vmatpush1.bf16.msra.mxu1 %v2810_v16 }
  0x90   :  { %222 = vmatprep.subr.bf16.mxu1 %v2815_v17 }
  0x93   :  { %223 = vmatpush1.bf16.msra.mxu1 %v2813_v18 }
  0x94   :  { %224 = vmatprep.subr.bf16.mxu1 %v2818_v19 }
  0x97   :  { %225 = vmatpush1.bf16.msra.mxu1 %v2816_v20 }
  0x98   :  { %2620 = vmatprep.subr.mxu1 %v2940_v3 }
 0x15d   :  { %v107_v22 = vpop.f32.mrb[0].mxu1 }
 0x15e   :  { %v2603_v24 = vpop.f32.mrb[1].mxu1  ;;  %v3053_v26 = vadd.f32 %v107_v22, %v55_v21 }
 0x15f   :  { %v110_v25 = vpop.f32.mrb[2].mxu1 }
 0x160   :  { %v3055_v27 = vadd.f32 %v110_v25, %v56_v23  ;;  %v2604_v28 = vpop.f32.mrb[3].mxu1 }
 0x162   :  { %v162_v29 = vpack.c.bf16 %v3055_v27, %v3053_v26 }
 0x164   :  { %2443 = vmatmul.mubr.msk.bf16.vlgmr.msra.gmra.mrb[4].mxu1 %vm214_vm4, %v162_v29 }
 0x165   :  { %2622 = vmatprep.mubr.msk.f32.mxu1 %vm2941_vm0, %v2940_v3 }
 0x237   :  { %v252_v36 = vpop.f32.mrb[4].mxu1 }
 0x238   :  { %v253_v37 = vadd.f32 %v252_v36, %v167_v34  ;;  %v254_v38 = vpop.f32.mrb[5].mxu1 }
 0x239   :  { %v3073_v39 = vadd.f32 %v254_v38, %v171_v35  ;;  %v256_v40 = vpop.f32.mrb[6].mxu1 }
 0x23a   :  { %v257_v41 = vadd.f32 %v256_v40, %v167_v34  ;;  %v258_v42 = vpop.f32.mrb[7].mxu1  ;;  %264 = vrot.lane.b32.xlu1 %v253_v37, %s2942_s15  ;;  %v261_v45 = vmul.f32 0.17677669, %v253_v37 }
 0x23b   :  { %v3076_v43 = vadd.f32 %v258_v42, %v171_v35 }
 0x23c   :  { %v262_v49 = vmul.f32 0.17677669, %v257_v41 }
 0x23d   :  { %2621 = vmatpush3.msra.mxu1 %v3076_v43 }
 0x23e   :  { %2630 = vmatprep.subr.mxu1 %v2940_v3 }
 0x2ac   :  { %v265_v44 = vpop.permute.xlu1 %264 }
 0x2ad   :  { %2606 = vmatpush3.xpose.msk.msra.mxu0 %vm69_vm3, %v265_v44  ;;  %v2820_v44 = vld [vmem:[%s3482_s4 + $0x8] sm:$0xff]  }
 0x2ae   :  { %2610 = vmatprep.subr.mxu0 %v2940_v3 }
 0x2b0   :  { %2608 = vmatmul.mubr.msk.f32.vlgmr.msra.gmra.mrb[0].mxu0 %vm69_vm3, %v261_v45 }
 0x2b1   :  { %2611 = vmatpush3.msra.mxu0 %v3073_v39  ;;  %2612 = vmatprep.mubr.msk.f32.mxu0 %vm2941_vm0, %v2940_v3 }
 0x2b2   :  { %2615 = vmatprep.subr.mxu0 %v2940_v3 }
 0x383   :  { %v337_v46 = vpop.f32.mrb[0].mxu0 }
 0x384   :  { %v2609_v47 = vpop.f32.mrb[1].mxu0  ;;  %v342_v48 = vsel %vm341_vm5, %v337_v46, -inf }
 0x385   :  { %343 = vmax.xlane.f32.xlu1 %v342_v48 }
 0x396   :  { %590 = vrot.lane.b32.xlu1 %v253_v37, %s2943_s16 }
 0x39a   :  { %588 = vrot.lane.b32.xlu1 %v261_v45, %s2944_s0  ;;  %v2821_v45 = vld [vmem:[%s3482_s4 + $0x10] sm:$0xff]  }
 0x39e   :  { %754 = vrot.lane.b32.xlu1 %v262_v49, %s2944_s0 }
 0x412   :  { %v344_v50 = vpop.xlane.xlu1 %343 }
 0x413   :  { %v345_v51 = vsub.f32 %v337_v46, %v344_v50  ;;  %v2822_v46 = vld [vmem:[%s3482_s4 + $0x18] sm:$0xff]  }
 0x415   :  { %v346_v52 = vmul.f32 1.442695, %v345_v51 }
 0x416   :  { %v591_v58 = vpop.permute.xlu1 %590 }
 0x417   :  { %2867 = vpow2.f32 %v346_v52 }
 0x41a   :  { %v589_v60 = vpop.permute.xlu1 %588 }
 0x41e   :  { %v755_v62 = vpop.permute.xlu1 %754 }
 0x421   :  { %v2868_v53 = vpop.eup %2867 }
 0x422   :  { %v348_v54 = vsel %vm341_vm5, %v2868_v53, 0.0 }
 0x423   :  { %349 = vadd.xlane.f32.xlu0 %v348_v54 }
 0x439   :  { %427 = vrot.lane.b32.xlu0 %v257_v41, %s2942_s15 }
 0x43d   :  { %756 = vrot.lane.b32.xlu0 %v257_v41, %s2943_s16 }
 0x4b0   :  { %v350_v55 = vpop.xlane.xlu0 %349 }
 0x4b1   :  { %2869 = vrcp.f32 %v350_v55 }
 0x4b4   :  { %v428_v59 = vpop.permute.xlu0 %427 }
 0x4b8   :  { %v757_v61 = vpop.permute.xlu0 %756 }
 0x4bb   :  { %v2870_v56 = vpop.eup %2869 }
 0x4bc   :  { %v352_v57 = vmul.f32 %v2870_v56, %v2868_v53 }
 0x4be   :  { %2613 = vmatmul.mubr.msk.f32.vlgmr.msra.gmra.mrb[2].mxu0 %vm341_vm5, %v352_v57 }
 0x4bf   :  { %2616 = vmatpush3.xpose.msk.msra.mxu0 %vm69_vm3, %v428_v59  ;;  %2617 = vmatprep.mubr.msk.f32.mxu0 %vm2941_vm0, %v2940_v3 }
 0x4c0   :  { %2625 = vmatprep.subr.mxu0 %v2940_v3 }
 0x4c2   :  { %2618 = vmatmul.mubr.msk.f32.vlgmr.msra.gmra.mrb[4].mxu0 %vm69_vm3, %v262_v49 }
 0x4c3   :  { %2626 = vmatpush3.xpose.msk.msra.mxu0 %vm69_vm3, %v591_v58  ;;  %2627 = vmatprep.mubr.msk.f32.mxu0 %vm2941_vm0, %v2940_v3 }
 0x4c4   :  { %2635 = vmatprep.subr.mxu0 %v2940_v3 }
 0x4c6   :  { %2628 = vmatmul.mubr.msk.f32.vlgmr.msra.gmra.mrb[6].mxu0 %vm69_vm3, %v589_v60  ;;  %v155_v60 = vld [vmem:[%s3485_s7 + $0x1] ss:$0 sm:$0xff] }
 0x4c7   :  { %2636 = vmatpush3.xpose.msk.msra.mxu0 %vm69_vm3, %v757_v61  ;;  %2637 = vmatprep.mubr.msk.f32.mxu0 %vm2941_vm0, %v2940_v3 }
 0x4c8   :  { %2645 = vmatprep.subr.bf16.mxu0 %v2940_v3 }
 0x4ca   :  { %2638 = vmatmul.mubr.msk.f32.vlgmr.msra.gmra.mrb[8].mxu0 %vm69_vm3, %v755_v62 }
 0x4cb   :  { %2653 = vmatprep.mubr.msk.bf16.mxu0 %vm2941_vm0, %v2940_v3 }
 0x591   :  { %v3112_v63 = vpop.f32.mrb[2].mxu0 }
 0x592   :  { %v2614_v0 = vpop.f32.mrb[3].mxu0 }
 0x595   :  { %v500_v2 = vpop.f32.mrb[4].mxu0 }
 0x596   :  { %v2619_v4 = vpop.f32.mrb[5].mxu0  ;;  %v504_v5 = vsel %vm341_vm5, %v500_v2, -inf }
 0x597   :  { %505 = vmax.xlane.f32.xlu0 %v504_v5 }
 0x599   :  { %v662_v6 = vpop.f32.mrb[6].mxu0 }
 0x59a   :  { %v2629_v7 = vpop.f32.mrb[7].mxu0  ;;  %v666_v8 = vsel %vm341_vm5, %v662_v6, -inf }
 0x59b   :  { %667 = vmax.xlane.f32.xlu1 %v666_v8 }
 0x59d   :  { %v828_v9 = vpop.f32.mrb[8].mxu0 }
 0x59e   :  { %v2639_v10 = vpop.f32.mrb[9].mxu0  ;;  %v832_v11 = vsel %vm341_vm5, %v828_v9, -inf }
 0x59f   :  { %833 = vmax.xlane.f32.xlu0 %v832_v11 }
 0x624   :  { %v506_v12 = vpop.xlane.xlu0 %505 }
 0x625   :  { %v507_v13 = vsub.f32 %v500_v2, %v506_v12 }
 0x627   :  { %v508_v14 = vmul.f32 1.442695, %v507_v13 }
 0x628   :  { %v668_v15 = vpop.xlane.xlu1 %667 }
 0x629   :  { %2871 = vpow2.f32 %v508_v14  ;;  %v669_v16 = vsub.f32 %v662_v6, %v668_v15 }
 0x62b   :  { %v670_v17 = vmul.f32 1.442695, %v669_v16 }
 0x62c   :  { %v834_v18 = vpop.xlane.xlu0 %833 }
 0x62d   :  { %2873 = vpow2.f32 %v670_v17  ;;  %v835_v19 = vsub.f32 %v828_v9, %v834_v18  ;;  %v2824_v18 = vld [vmem:[%s3483_s5 + $0x8] sm:$0xff]  }
 0x62f   :  { %v836_v20 = vmul.f32 1.442695, %v835_v19  ;;  %v2825_v19 = vld [vmem:[%s3483_s5 + $0x10] sm:$0xff]  }
 0x631   :  { %2875 = vpow2.f32 %v836_v20  ;;  %v2826_v20 = vld [vmem:[%s3483_s5 + $0x18] sm:$0xff]  }
 0x633   :  { %v2872_v21 = vpop.eup %2871 }
 0x634   :  { %v510_v22 = vsel %vm341_vm5, %v2872_v21, 0.0 }
 0x635   :  { %511 = vadd.xlane.f32.xlu0 %v510_v22  ;;  %v2828_v22 = vld [vmem:[%s3484_s6 + $0x8] sm:$0xff]  }
 0x637   :  { %v2874_v23 = vpop.eup %2873 }
 0x638   :  { %v672_v24 = vsel %vm341_vm5, %v2874_v23, 0.0 }
 0x639   :  { %673 = vadd.xlane.f32.xlu1 %v672_v24  ;;  %v2830_v24 = vld [vmem:[%s3484_s6 + $0x18] sm:$0xff]  }
 0x63b   :  { %v2876_v25 = vpop.eup %2875 }
 0x63c   :  { %v838_v28 = vsel %vm341_vm5, %v2876_v25, 0.0 }
 0x63d   :  { %839 = vadd.xlane.f32.xlu0 %v838_v28  ;;  %v2832_v28 = vld [vmem:[%s3484_s6 + $0x28] sm:$0xff]  }
 0x64a   :  { %678 = vrot.lane.b32.xlu1 %v3073_v39, %s2944_s0 }
 0x653   :  { %844 = vrot.lane.b32.xlu0 %v3076_v43, %s2944_s0  ;;  %v2819_v43 = vld [vmem:[%s3482_s4] sm:$0xff]  }
 0x654   :  { %2646 = vmatpush3.bf16.msra.mxu0 %v2819_v43 }
 0x655   :  { %2647 = vmatprep.subr.bf16.mxu0 %v2940_v3 }
 0x658   :  { %2648 = vmatpush3.bf16.msra.mxu0 %v2820_v44  ;;  %v157_v44 = vld [vmem:[%s3485_s7 + $0x3] ss:$0 sm:$0xff] }
 0x659   :  { %2649 = vmatprep.subr.bf16.mxu0 %v2940_v3 }
 0x65c   :  { %2650 = vmatpush3.bf16.msra.mxu0 %v2821_v45 }
 0x65d   :  { %2651 = vmatprep.subr.bf16.mxu0 %v2940_v3 }
 0x660   :  { %2652 = vmatpush3.bf16.msra.mxu0 %v2822_v46 }
 0x661   :  { %2669 = vmatprep.subr.bf16.mxu0 %v2940_v3 }
 0x6c2   :  { %v512_v29 = vpop.xlane.xlu0 %511 }
 0x6c3   :  { %2877 = vrcp.f32 %v512_v29 }
 0x6c6   :  { %v674_v32 = vpop.xlane.xlu1 %673 }
 0x6c7   :  { %2879 = vrcp.f32 %v674_v32 }
 0x6ca   :  { %v840_v34 = vpop.xlane.xlu0 %839  ;;  %v679_v37 = vpop.permute.xlu1 %678 }
 0x6cb   :  { %2881 = vrcp.f32 %v840_v34 }
 0x6cd   :  { %v2878_v35 = vpop.eup %2877 }
 0x6ce   :  { %v514_v36 = vmul.f32 %v2878_v35, %v2872_v21  ;;  %v845_v40 = vpop.permute.xlu0 %844  ;;  %v2827_v21 = vld [vmem:[%s3484_s6] sm:$0xff]  }
 0x6d0   :  { %2623 = vmatmul.mubr.msk.f32.vlgmr.msra.gmra.mrb[8].mxu1 %vm341_vm5, %v514_v36 }
 0x6d1   :  { %v2880_v38 = vpop.eup %2879  ;;  %2631 = vmatpush3.msra.mxu1 %v679_v37  ;;  %2632 = vmatprep.mubr.msk.f32.mxu1 %vm2941_vm0, %v2940_v3 }
 0x6d2   :  { %v676_v39 = vmul.f32 %v2880_v38, %v2874_v23  ;;  %2640 = vmatprep.subr.mxu1 %v2940_v3  ;;  %v2829_v23 = vld [vmem:[%s3484_s6 + $0x10] sm:$0xff]  }
 0x6d4   :  { %2633 = vmatmul.mubr.msk.f32.vlgmr.msra.gmra.mrb[10].mxu1 %vm341_vm5, %v676_v39  ;;  %v156_v39 = vld [vmem:[%s3485_s7 + $0x2] ss:$0 sm:$0xff] }
 0x6d5   :  { %v2882_v41 = vpop.eup %2881  ;;  %2641 = vmatpush3.msra.mxu1 %v845_v40  ;;  %2642 = vmatprep.mubr.msk.f32.mxu1 %vm2941_vm0, %v2940_v3 }
 0x6d6   :  { %v842_v42 = vmul.f32 %v2882_v41, %v2876_v25  ;;  %2657 = vmatprep.subr.bf16.mxu1 %v2940_v3  ;;  %v2831_v25 = vld [vmem:[%s3484_s6 + $0x20] sm:$0xff]  }
 0x6d8   :  { %2643 = vmatmul.mubr.msk.f32.vlgmr.msra.gmra.mrb[12].mxu1 %vm341_vm5, %v842_v42 }
 0x6d9   :  { %2665 = vmatprep.mubr.msk.bf16.mxu1 %vm2941_vm0, %v2940_v3 }
 0x7a3   :  { %v584_v47 = vpop.f32.mrb[8].mxu1 }
 0x7a4   :  { %v2624_v48 = vpop.f32.mrb[9].mxu1 }
 0x7a7   :  { %v750_v49 = vpop.f32.mrb[10].mxu1 }
 0x7a8   :  { %v2634_v50 = vpop.f32.mrb[11].mxu1 }
 0x7a9   :  { %v2834_v50 = vld [vmem:[%s3484_s6 + $0x38] sm:$0xff]  }
 0x7ab   :  { %v916_v51 = vpop.f32.mrb[12].mxu1 }
 0x7ac   :  { %v2795_v52 = vpack.i.bf16 %v916_v51, %v750_v49  ;;  %v2644_v53 = vpop.f32.mrb[13].mxu1  ;;  %v2833_v49 = vld [vmem:[%s3484_s6 + $0x30] sm:$0xff]   ;;  %v158_v51 = vld [vmem:[%s3485_s7 + $0x4] ss:$0 sm:$0xff] }
 0x7ae   :  { %2796 = vrot.lane.b32.xlu1 %v2795_v52, %s2943_s16 }
 0x820   :  { %v2797_v54 = vpop.permute.xlu1 %2796 }
 0x821   :  { %v2799_v55 = vunpack.i.h.bf16 %v2797_v54  ;;  %v2798_v56 = vunpack.i.l.bf16 %v2797_v54 }
 0x823   :  { %v929_v57 = vsel %vm69_vm3, %v584_v47, %v2799_v55  ;;  %v928_v58 = vsel %vm69_vm3, %v3112_v63, %v2798_v56 }
 0x824   :  { %v930_v59 = vpack.c.bf16 %v929_v57, %v928_v58 }
 0x826   :  { %2654 = vmatmul.mubr.msk.bf16.vlgmr.msra.gmra.mrb[12].mxu0 %vm214_vm4, %v930_v59 }
 0x827   :  { %2685 = vmatprep.mubr.msk.bf16.mxu0 %vm2941_vm0, %v2940_v3  ;;  %2670 = vmatpush3.bf16.msra.mxu0 %v2827_v21  ;;  %v2843_v21 = vld [vmem:[%s3481_s3 + $0x64] ss:$8 sps:$4 sm:$0xff]  }
 0x828   :  { %2671 = vmatprep.subr.bf16.mxu0 %v2940_v3 }
 0x82b   :  { %2672 = vmatpush3.bf16.msra.mxu0 %v2828_v22  ;;  %v2841_v22 = vld [vmem:[%s3481_s3 + $0x60] ss:$8 sps:$4 sm:$0xff]  }
 0x82c   :  { %2673 = vmatprep.subr.bf16.mxu0 %v2940_v3 }
 0x82f   :  { %2674 = vmatpush3.bf16.msra.mxu0 %v2829_v23  ;;  %v2844_v23 = vld [vmem:[%s3481_s3 + $0x70] ss:$8 sps:$4 sm:$0xff]  }
 0x830   :  { %2675 = vmatprep.subr.bf16.mxu0 %v2940_v3 }
 0x833   :  { %2676 = vmatpush3.bf16.msra.mxu0 %v2830_v24  ;;  %v2846_v24 = vld [vmem:[%s3481_s3 + $0x74] ss:$8 sps:$4 sm:$0xff]  }
 0x834   :  { %2677 = vmatprep.subr.bf16.mxu0 %v2940_v3 }
 0x837   :  { %2678 = vmatpush3.bf16.msra.mxu0 %v2831_v25 }
 0x838   :  { %2679 = vmatprep.subr.bf16.mxu0 %v2940_v3 }
 0x83b   :  { %2680 = vmatpush3.bf16.msra.mxu0 %v2832_v28 }
 0x83c   :  { %2681 = vmatprep.subr.bf16.mxu0 %v2940_v3 }
 0x83f   :  { %2682 = vmatpush3.bf16.msra.mxu0 %v2833_v49 }
 0x840   :  { %2683 = vmatprep.subr.bf16.mxu0 %v2940_v3 }
 0x843   :  { %2684 = vmatpush3.bf16.msra.mxu0 %v2834_v50 }
 0x844   :  { %2709 = vmatprep.subr.mxu0 %v2940_v3 }
 0x8f9   :  { %v992_v61 = vpop.f32.mrb[12].mxu0 }
 0x8fa   :  { %v993_v62 = vadd.f32 %v992_v61, %v155_v60  ;;  %v2655_v0 = vpop.f32.mrb[13].mxu0 }
 0x8fb   :  { %v995_v2 = vpop.f32.mrb[14].mxu0 }
 0x8fc   :  { %v996_v4 = vadd.f32 %v995_v2, %v155_v60  ;;  %v2656_v5 = vpop.f32.mrb[15].mxu0  ;;  %v999_v6 = vadd.f32 %v993_v62, %v3053_v26  ;;  %v159_v60 = vld [vmem:[%s3485_s7 + $0x5] ss:$0 sm:$0xff] }
 0x8fe   :  { %v1001_v63 = vsel %vm214_vm4, %v999_v6, 0.0  ;;  %v1000_v7 = vadd.f32 %v996_v4, %v3055_v27  ;;  %v2823_v27 = vld [vmem:[%s3483_s5] sm:$0xff]  }
 0x8ff   :  { %1002 = vadd.xlane.f32.xlu1 %v1001_v63  ;;  %2658 = vmatpush3.bf16.msra.mxu1 %v2823_v27  ;;  %v2837_v27 = vld [vmem:[%s3481_s3 + $0x44] ss:$8 sps:$4 sm:$0xff]  }
 0x900   :  { %v1004_v8 = vsel %vm214_vm4, %v1000_v7, 0.0  ;;  %2659 = vmatprep.subr.bf16.mxu1 %v2940_v3 }
 0x901   :  { %1005 = vadd.xlane.f32.xlu0 %v1004_v8 }
 0x903   :  { %2660 = vmatpush3.bf16.msra.mxu1 %v2824_v18  ;;  %v2835_v18 = vld [vmem:[%s3481_s3 + $0x40] ss:$8 sps:$4 sm:$0xff]  }
 0x904   :  { %2661 = vmatprep.subr.bf16.mxu1 %v2940_v3 }
 0x907   :  { %2662 = vmatpush3.bf16.msra.mxu1 %v2825_v19  ;;  %v2840_v19 = vld [vmem:[%s3481_s3 + $0x54] ss:$8 sps:$4 sm:$0xff]  }
 0x908   :  { %2663 = vmatprep.subr.bf16.mxu1 %v2940_v3 }
 0x90b   :  { %2664 = vmatpush3.bf16.msra.mxu1 %v2826_v20  ;;  %v2838_v20 = vld [vmem:[%s3481_s3 + $0x50] ss:$8 sps:$4 sm:$0xff]  }
 0x90c   :  { %1329 = vmatprep.subr.bf16.mxu1 %v2837_v27 }
 0x98c   :  { %v1003_v9 = vpop.xlane.xlu1 %1002 }
 0x98d   :  { %v1008_v10 = vmul.f32 0.015625, %v1003_v9 }
 0x98e   :  { %v1006_v11 = vpop.xlane.xlu0 %1005 }
 0x98f   :  { %v1010_v12 = vsub.f32 %v999_v6, %v1008_v10  ;;  %v1009_v13 = vmul.f32 0.015625, %v1006_v11 }
 0x991   :  { %v1011_v14 = vsub.f32 %v1000_v7, %v1009_v13  ;;  %v1012_v15 = vmul.f32 %v1010_v12, %v1010_v12 }
 0x993   :  { %v1014_v16 = vsel %vm214_vm4, %v1012_v15, 0.0  ;;  %v1013_v17 = vmul.f32 %v1011_v14, %v1011_v14 }
 0x994   :  { %1015 = vadd.xlane.f32.xlu0 %v1014_v16 }
 0x995   :  { %v1017_v26 = vsel %vm214_vm4, %v1013_v17, 0.0 }
 0x996   :  { %1018 = vadd.xlane.f32.xlu1 %v1017_v26 }
 0xa21   :  { %v1016_v29 = vpop.xlane.xlu0 %1015 }
 0xa22   :  { %v1020_v32 = vmul.f32 0.015625, %v1016_v29 }
 0xa23   :  { %v1019_v34 = vpop.xlane.xlu1 %1018 }
 0xa24   :  { %v1022_v35 = vadd.f32 1e-05, %v1020_v32  ;;  %v1021_v36 = vmul.f32 0.015625, %v1019_v34 }
 0xa26   :  { %2883 = vrsqrt.f32 %v1022_v35  ;;  %v1023_v37 = vadd.f32 1e-05, %v1021_v36 }
 0xa28   :  { %2885 = vrsqrt.f32 %v1023_v37  ;;  %v160_v37 = vld [vmem:[%s3485_s7 + $0x6] ss:$0 sm:$0xff] }
 0xa30   :  { %v2884_v38 = vpop.eup %2883 }
 0xa31   :  { %v1026_v40 = vmul.f32 %v2884_v38, %v1010_v12 }
 0xa32   :  { %v2886_v41 = vpop.eup %2885 }
 0xa33   :  { %v1028_v42 = vmul.f32 %v1026_v40, %v156_v39  ;;  %v1027_v43 = vmul.f32 %v2886_v41, %v1011_v14 }
 0xa35   :  { %v1029_v45 = vmul.f32 %v1027_v43, %v156_v39  ;;  %v1030_v46 = vadd.f32 %v1028_v42, %v157_v44  ;;  %v161_v42 = vld [vmem:[%s3485_s7 + $0x7] ss:$0 sm:$0xff] }
 0xa37   :  { %v1031_v47 = vadd.f32 %v1029_v45, %v157_v44 }
 0xa39   :  { %v1032_v48 = vpack.c.bf16 %v1031_v47, %v1030_v46 }
 0xa3b   :  { %2666 = vmatmul.mubr.msk.bf16.vlgmr.msra.gmra.mrb[16].mxu1 %vm214_vm4, %v1032_v48 }
 0xa3c   :  { %1361 = vmatprep.mubr.bf16.mxu1 %v2939_v1  ;;  %1330 = vmatpush1.bf16.msra.mxu1 %v2835_v18 }
 0xa3d   :  { %1331 = vmatprep.subr.bf16.mxu1 %v2840_v19 }
 0xa40   :  { %1332 = vmatpush1.bf16.msra.mxu1 %v2838_v20 }
 0xa41   :  { %1333 = vmatprep.subr.bf16.mxu1 %v2843_v21 }
 0xa44   :  { %1334 = vmatpush1.bf16.msra.mxu1 %v2841_v22 }
 0xa45   :  { %1335 = vmatprep.subr.bf16.mxu1 %v2846_v24 }
 0xa48   :  { %1336 = vmatpush1.bf16.msra.mxu1 %v2844_v23 }
 0xa49   :  { %2689 = vmatprep.subr.mxu1 %v2940_v3 }
 0xb0e   :  { %v1094_v52 = vpop.f32.mrb[16].mxu1 }
 0xb0f   :  { %v1095_v1 = vadd.f32 %v1094_v52, %v158_v51  ;;  %v2667_v53 = vpop.f32.mrb[17].mxu1 }
 0xb10   :  { %v1097_v54 = vpop.f32.mrb[18].mxu1 }
 0xb11   :  { %v1098_v55 = vadd.f32 %v1097_v54, %v158_v51  ;;  %v2668_v56 = vpop.f32.mrb[19].mxu1  ;;  %v1101_v57 = vmax.f32 %v1095_v1, 0.0 }
 0xb13   :  { %v1102_v58 = vmax.f32 %v1098_v55, 0.0 }
 0xb15   :  { %v1103_v59 = vpack.c.bf16 %v1102_v58, %v1101_v57 }
 0xb17   :  { %2686 = vmatmul.mubr.bf16.vlgmr.msra.gmra.mrb[16].mxu0 %v1103_v59 }
 0xb18   :  { %2711 = vmatprep.mubr.msk.f32.mxu0 %vm2941_vm0, %v2940_v3 }
 0xbea   :  { %v1186_v61 = vpop.f32.mrb[16].mxu0 }
 0xbeb   :  { %v1187_v62 = vadd.f32 %v1186_v61, %v159_v60  ;;  %v2687_v0 = vpop.f32.mrb[17].mxu0 }
 0xbec   :  { %v1189_v2 = vpop.f32.mrb[18].mxu0 }
 0xbed   :  { %v1190_v4 = vadd.f32 %v1189_v2, %v159_v60  ;;  %v2688_v5 = vpop.f32.mrb[19].mxu0  ;;  %v1193_v6 = vadd.f32 %v1187_v62, %v1030_v46 }
 0xbef   :  { %v1195_v63 = vsel %vm214_vm4, %v1193_v6, 0.0  ;;  %v1194_v7 = vadd.f32 %v1190_v4, %v1031_v47  ;;  %v2474_v47 = vld [vmem:[%s3485_s7 + $0x10] ss:$8 sm:$0x3] }
 0xbf0   :  { %1196 = vadd.xlane.f32.xlu0 %v1195_v63  ;;  %v1279_v48 = vrot.slane %v2474_v47, %v166_v31  ;;  %v1283_v52 = vrot.slane %v2474_v47, %v170_v33 }
 0xbf1   :  { %v1198_v8 = vsel %vm214_vm4, %v1194_v7, 0.0 }
 0xbf2   :  { %1199 = vadd.xlane.f32.xlu1 %v1198_v8 }
 0xc7d   :  { %v1197_v9 = vpop.xlane.xlu0 %1196 }
 0xc7e   :  { %v1201_v10 = vmul.f32 0.015625, %v1197_v9 }
 0xc7f   :  { %v1200_v11 = vpop.xlane.xlu1 %1199 }
 0xc80   :  { %v1203_v12 = vsub.f32 %v1193_v6, %v1201_v10  ;;  %v1202_v13 = vmul.f32 0.015625, %v1200_v11 }
 0xc82   :  { %v1204_v14 = vsub.f32 %v1194_v7, %v1202_v13  ;;  %v1205_v15 = vmul.f32 %v1203_v12, %v1203_v12 }
 0xc84   :  { %v1207_v16 = vsel %vm214_vm4, %v1205_v15, 0.0  ;;  %v1206_v17 = vmul.f32 %v1204_v14, %v1204_v14 }
 0xc85   :  { %1208 = vadd.xlane.f32.xlu0 %v1207_v16 }
 0xc86   :  { %v1210_v26 = vsel %vm214_vm4, %v1206_v17, 0.0 }
 0xc87   :  { %1211 = vadd.xlane.f32.xlu1 %v1210_v26 }
 0xd12   :  { %v1209_v25 = vpop.xlane.xlu0 %1208 }
 0xd13   :  { %v1213_v28 = vmul.f32 0.015625, %v1209_v25 }
 0xd14   :  { %v1212_v29 = vpop.xlane.xlu1 %1211 }
 0xd15   :  { %v1215_v32 = vadd.f32 1e-05, %v1213_v28  ;;  %v1214_v34 = vmul.f32 0.015625, %v1212_v29 }
 0xd17   :  { %2887 = vrsqrt.f32 %v1215_v32  ;;  %v1216_v35 = vadd.f32 1e-05, %v1214_v34 }
 0xd19   :  { %2889 = vrsqrt.f32 %v1216_v35 }
 0xd21   :  { %v2888_v36 = vpop.eup %2887 }
 0xd22   :  { %v1219_v38 = vmul.f32 %v2888_v36, %v1203_v12 }
 0xd23   :  { %v2890_v39 = vpop.eup %2889 }
 0xd24   :  { %v1221_v40 = vmul.f32 %v1219_v38, %v160_v37  ;;  %v1220_v41 = vmul.f32 %v2890_v39, %v1204_v14 }
 0xd26   :  { %v1222_v43 = vmul.f32 %v1220_v41, %v160_v37  ;;  %v3265_v44 = vadd.f32 %v1221_v40, %v161_v42 }
 0xd28   :  { %v3267_v45 = vadd.f32 %v1222_v43, %v161_v42 }
 0xd2a   :  { %v1274_v46 = vpack.c.bf16 %v3267_v45, %v3265_v44 }
 0xd2c   :  { %2483 = vmatmul.mubr.msk.bf16.vlgmr.msra.gmra.mrb[20].mxu1 %vm214_vm4, %v1274_v46 }
 0xd2d   :  { %2691 = vmatprep.mubr.msk.f32.mxu1 %vm2941_vm0, %v2940_v3 }
 0xdff   :  { %v1363_v49 = vpop.f32.mrb[20].mxu1 }
 0xe00   :  { %v1364_v50 = vadd.f32 %v1363_v49, %v1279_v48  ;;  %v1365_v51 = vpop.f32.mrb[21].mxu1 }
 0xe01   :  { %v1367_v1 = vpop.f32.mrb[22].mxu1  ;;  %v3289_v30 = vadd.f32 %v1365_v51, %v1283_v52 }
 0xe02   :  { %v1369_v53 = vpop.f32.mrb[23].mxu1  ;;  %1375 = vrot.lane.b32.xlu0 %v1364_v50, %s2942_s15  ;;  %v1368_v55 = vadd.f32 %v1367_v1, %v1279_v48  ;;  %v1372_v56 = vmul.f32 0.17677669, %v1364_v50  ;;  %v2847_v1 = vld [vmem:[%s3482_s4 + $0x20] sm:$0xff]  }
 0xe03   :  { %v3282_v54 = vadd.f32 %v1369_v53, %v1283_v52  ;;  %v2848_v53 = vld [vmem:[%s3482_s4 + $0x28] sm:$0xff]  }
 0xe04   :  { %v1373_v57 = vmul.f32 0.17677669, %v1368_v55 }
 0xe06   :  { %1700 = vrot.lane.b32.xlu0 %v1364_v50, %s2943_s16 }
 0xe0a   :  { %1698 = vrot.lane.b32.xlu0 %v1372_v56, %s2944_s0 }
 0xe0e   :  { %1864 = vrot.lane.b32.xlu0 %v1373_v57, %s2944_s0 }
 0xe74   :  { %v1376_v31 = vpop.permute.xlu0 %1375 }
 0xe75   :  { %2690 = vmatpush3.xpose.msk.msra.mxu1 %vm69_vm3, %v1376_v31 }
 0xe76   :  { %2694 = vmatprep.subr.mxu1 %v2940_v3 }
 0xe78   :  { %v1701_v33 = vpop.permute.xlu0 %1700  ;;  %2692 = vmatmul.mubr.msk.f32.vlgmr.msra.gmra.mrb[14].mxu1 %vm69_vm3, %v1372_v56 }
 0xe79   :  { %2695 = vmatpush3.msra.mxu1 %v3289_v30  ;;  %2710 = vmatpush3.xpose.msk.msra.mxu0 %vm69_vm3, %v1701_v33 }
 0xe7a   :  { %2719 = vmatprep.subr.mxu0 %v2940_v3  ;;  %2696 = vmatprep.mubr.msk.f32.mxu1 %vm2941_vm0, %v2940_v3 }
 0xe7b   :  { %2699 = vmatprep.subr.mxu1 %v2940_v3 }
 0xe7c   :  { %v1699_v58 = vpop.permute.xlu0 %1698 }
 0xe7d   :  { %2712 = vmatmul.mubr.msk.f32.vlgmr.msra.gmra.mrb[10].mxu0 %vm69_vm3, %v1699_v58 }
 0xe7e   :  { %2721 = vmatprep.mubr.msk.f32.mxu0 %vm2941_vm0, %v2940_v3 }
 0xe80   :  { %v1865_v11 = vpop.permute.xlu0 %1864 }
 0xf4b   :  { %v1448_v59 = vpop.f32.mrb[14].mxu1 }
 0xf4c   :  { %v2693_v60 = vpop.f32.mrb[15].mxu1  ;;  %v1452_v61 = vsel %vm341_vm5, %v1448_v59, -inf }
 0xf4d   :  { %1453 = vmax.xlane.f32.xlu1 %v1452_v61 }
 0xf50   :  { %v1772_v62 = vpop.f32.mrb[10].mxu0 }
 0xf51   :  { %v2713_v0 = vpop.f32.mrb[11].mxu0  ;;  %v1776_v2 = vsel %vm341_vm5, %v1772_v62, -inf }
 0xf52   :  { %1777 = vmax.xlane.f32.xlu0 %v1776_v2 }
 0xf5e   :  { %1537 = vrot.lane.b32.xlu1 %v1368_v55, %s2942_s15  ;;  %s2945_s15 = smov [#allocation2]  }
 0xfda   :  { %v1454_v4 = vpop.xlane.xlu1 %1453 }
 0xfdb   :  { %v1455_v5 = vsub.f32 %v1448_v59, %v1454_v4 }
 0xfdd   :  { %v1456_v6 = vmul.f32 1.442695, %v1455_v5  ;;  %v1267_v5 = vld [vmem:[%s3485_s7 + $0x11] ss:$0 sm:$0xff] }
 0xfde   :  { %v1538_v8 = vpop.permute.xlu1 %1537 }
 0xfdf   :  { %2891 = vpow2.f32 %v1456_v6  ;;  %v1778_v14 = vpop.xlane.xlu0 %1777 }
 0xfe0   :  { %v1779_v15 = vsub.f32 %v1772_v62, %v1778_v14 }
 0xfe2   :  { %v1780_v16 = vmul.f32 1.442695, %v1779_v15 }
 0xfe9   :  { %v2892_v63 = vpop.eup %2891 }
 0xfea   :  { %v1458_v7 = vsel %vm341_vm5, %v2892_v63, 0.0 }
 0xfeb   :  { %1459 = vadd.xlane.f32.xlu1 %v1458_v7 }
 0xffc   :  { %1866 = vrot.lane.b32.xlu1 %v1368_v55, %s2943_s16  ;;  %v2850_v55 = vld [vmem:[%s3482_s4 + $0x38] sm:$0xff]  }
0x1078   :  { %v1460_v9 = vpop.xlane.xlu1 %1459 }
0x1079   :  { %2893 = vrcp.f32 %v1460_v9 }
0x107a   :  { %2895 = vpow2.f32 %v1780_v16 }
0x107c   :  { %v1867_v10 = vpop.permute.xlu1 %1866 }
0x107d   :  { %2720 = vmatpush3.xpose.msk.msra.mxu0 %vm69_vm3, %v1867_v10 }
0x107e   :  { %2729 = vmatprep.subr.bf16.mxu0 %v2940_v3 }
0x1080   :  { %2722 = vmatmul.mubr.msk.f32.vlgmr.msra.gmra.mrb[20].mxu0 %vm69_vm3, %v1865_v11 }
0x1081   :  { %2737 = vmatprep.mubr.msk.bf16.mxu0 %vm2941_vm0, %v2940_v3  ;;  %2730 = vmatpush3.bf16.msra.mxu0 %v2847_v1 }
0x1082   :  { %2731 = vmatprep.subr.bf16.mxu0 %v2940_v3 }
0x1083   :  { %v2894_v12 = vpop.eup %2893 }
0x1084   :  { %v1462_v13 = vmul.f32 %v2894_v12, %v2892_v63  ;;  %v2896_v18 = vpop.eup %2895 }
0x1085   :  { %v1782_v19 = vsel %vm341_vm5, %v2896_v18, 0.0  ;;  %2732 = vmatpush3.bf16.msra.mxu0 %v2848_v53 }
0x1086   :  { %2697 = vmatmul.mubr.msk.f32.vlgmr.msra.gmra.mrb[24].mxu1 %vm341_vm5, %v1462_v13  ;;  %2733 = vmatprep.subr.bf16.mxu0 %v2940_v3 }
0x1087   :  { %2700 = vmatpush3.xpose.msk.msra.mxu1 %vm69_vm3, %v1538_v8  ;;  %2701 = vmatprep.mubr.msk.f32.mxu1 %vm2941_vm0, %v2940_v3 }
0x1088   :  { %2704 = vmatprep.subr.mxu1 %v2940_v3 }
0x108a   :  { %2702 = vmatmul.mubr.msk.f32.vlgmr.msra.gmra.mrb[26].mxu1 %vm69_vm3, %v1373_v57 }
0x108b   :  { %2705 = vmatpush3.msra.mxu1 %v3282_v54  ;;  %2706 = vmatprep.mubr.msk.f32.mxu1 %vm2941_vm0, %v2940_v3 }
0x108c   :  { %2714 = vmatprep.subr.mxu1 %v2940_v3 }
0x1153   :  { %v1938_v17 = vpop.f32.mrb[20].mxu0 }
0x1154   :  { %v2723_v26 = vpop.f32.mrb[21].mxu0  ;;  %v1942_v27 = vsel %vm341_vm5, %v1938_v17, -inf }
0x1155   :  { %1943 = vmax.xlane.f32.xlu0 %v1942_v27 }
0x1159   :  { %v3323_v20 = vpop.f32.mrb[24].mxu1  ;;  %1783 = vadd.xlane.f32.xlu0 %v1782_v19 }
0x115a   :  { %v2698_v21 = vpop.f32.mrb[25].mxu1 }
0x115d   :  { %v1610_v22 = vpop.f32.mrb[26].mxu1 }
0x115e   :  { %v2703_v23 = vpop.f32.mrb[27].mxu1  ;;  %v1614_v24 = vsel %vm341_vm5, %v1610_v22, -inf }
0x115f   :  { %1615 = vmax.xlane.f32.xlu1 %v1614_v24  ;;  %v2853_v23 = vld [vmem:[%s3483_s5 + $0x30] sm:$0xff]   ;;  %v2854_v24 = vld [vmem:[%s3483_s5 + $0x38] sm:$0xff]  }
0x116f   :  { %1788 = vrot.lane.b32.xlu0 %v3289_v30, %s2944_s0 }
0x11e2   :  { %v1944_v25 = vpop.xlane.xlu0 %1943 }
0x11e3   :  { %v1945_v28 = vsub.f32 %v1938_v17, %v1944_v25  ;;  %v2855_v25 = vld [vmem:[%s3484_s6 + $0x40] sm:$0xff]  }
0x11e5   :  { %v1946_v29 = vmul.f32 1.442695, %v1945_v28  ;;  %v2856_v28 = vld [vmem:[%s3484_s6 + $0x48] sm:$0xff]  }
0x11e6   :  { %v1784_v41 = vpop.xlane.xlu0 %1783 }
0x11e7   :  { %2897 = vpow2.f32 %v1946_v29  ;;  %v2857_v29 = vld [vmem:[%s3484_s6 + $0x50] sm:$0xff]  }
0x11ea   :  { %v1789_v48 = vpop.permute.xlu0 %1788 }
0x11ec   :  { %v1616_v32 = vpop.xlane.xlu1 %1615 }
0x11ed   :  { %v1617_v34 = vsub.f32 %v1610_v22, %v1616_v32  ;;  %v2852_v22 = vld [vmem:[%s3483_s5 + $0x28] sm:$0xff]   ;;  %v2858_v32 = vld [vmem:[%s3484_s6 + $0x58] sm:$0xff]  }
0x11ef   :  { %v1618_v35 = vmul.f32 1.442695, %v1617_v34  ;;  %v2859_v34 = vld [vmem:[%s3484_s6 + $0x60] sm:$0xff]  }
0x11f1   :  { %v2898_v36 = vpop.eup %2897  ;;  %2899 = vpow2.f32 %v1618_v35  ;;  %v2860_v35 = vld [vmem:[%s3484_s6 + $0x68] sm:$0xff]  }
0x11f2   :  { %v1948_v37 = vsel %vm341_vm5, %v2898_v36, 0.0 }
0x11f3   :  { %1949 = vadd.xlane.f32.xlu1 %v1948_v37 }
0x11fb   :  { %v2900_v38 = vpop.eup %2899 }
0x11fc   :  { %v1620_v39 = vsel %vm341_vm5, %v2900_v38, 0.0 }
0x11fd   :  { %1621 = vadd.xlane.f32.xlu1 %v1620_v39 }
0x120e   :  { %1954 = vrot.lane.b32.xlu1 %v3282_v54, %s2944_s0  ;;  %v2849_v54 = vld [vmem:[%s3482_s4 + $0x30] sm:$0xff]   ;;  %s2419_s0 = sshll.u32 %s2945_s15, 4  ;;  %s2420_s0 = int_to_ptr.vmem [resolvable:$true] %s2419_s0 }
0x120f   :  { %2734 = vmatpush3.bf16.msra.mxu0 %v2849_v54  ;;  %v2861_v54 = vld [vmem:[%s3484_s6 + $0x70] sm:$0xff]   ;;  %s2915_s17 = scalar_lea.vmem %s2420_s0, 256  ;;  %p2920_p1 = scmp.lt.s32.totalorder %s2420_s0, %s2420_s0 }
0x1210   :  { %2735 = vmatprep.subr.bf16.mxu0 %v2940_v3  ;;  %p2916_p0 = scmp.ne.s32.totalorder %s2420_s0, %s2915_s17  ;;  %p2921_p2 = scmp.lt.s32.totalorder %s2915_s17, %s2915_s17 }
0x1212   :  { %p2922_p3 = por %p2921_p2, %p2920_p1 }
0x1213   :  { %2736 = vmatpush3.bf16.msra.mxu0 %v2850_v55  ;;  %v2862_v55 = vld [vmem:[%s3484_s6 + $0x78] sm:$0xff]  }
0x1214   :  { %2753 = vmatprep.subr.bf16.mxu0 %v2940_v3  ;;  %p2923_p4 = pnand %p2922_p3, %p2916_p0 }
0x1280   :  { %v1950_v40 = vpop.xlane.xlu1 %1949 }
0x128a   :  { %v1622_v42 = vpop.xlane.xlu1 %1621 }
0x128b   :  { %2901 = vrcp.f32 %v1622_v42 }
0x128c   :  { %2903 = vrcp.f32 %v1784_v41 }
0x128d   :  { %2905 = vrcp.f32 %v1950_v40 }
0x128e   :  { %v1955_v51 = vpop.permute.xlu1 %1954 }
0x1295   :  { %v2902_v43 = vpop.eup %2901 }
0x1296   :  { %v1624_v46 = vmul.f32 %v2902_v43, %v2900_v38  ;;  %v2904_v47 = vpop.eup %2903 }
0x1297   :  { %v1786_v49 = vmul.f32 %v2904_v47, %v2896_v18  ;;  %v2906_v50 = vpop.eup %2905 }
0x1298   :  { %2707 = vmatmul.mubr.msk.f32.vlgmr.msra.gmra.mrb[28].mxu1 %vm341_vm5, %v1624_v46  ;;  %v1952_v52 = vmul.f32 %v2906_v50, %v2898_v36  ;;  %v1268_v46 = vld [vmem:[%s3485_s7 + $0x12] ss:$0 sm:$0xff]  ;;  %v1269_v50 = vld [vmem:[%s3485_s7 + $0x13] ss:$0 sm:$0xff] }
0x1299   :  { %2715 = vmatpush3.msra.mxu1 %v1789_v48  ;;  %2716 = vmatprep.mubr.msk.f32.mxu1 %vm2941_vm0, %v2940_v3 }
0x129a   :  { %2724 = vmatprep.subr.mxu1 %v2940_v3 }
0x129c   :  { %2717 = vmatmul.mubr.msk.f32.vlgmr.msra.gmra.mrb[30].mxu1 %vm341_vm5, %v1786_v49 }
0x129d   :  { %2725 = vmatpush3.msra.mxu1 %v1955_v51  ;;  %2726 = vmatprep.mubr.msk.f32.mxu1 %vm2941_vm0, %v2940_v3 }
0x129e   :  { %2741 = vmatprep.subr.bf16.mxu1 %v2940_v3 }
0x12a0   :  { %2727 = vmatmul.mubr.msk.f32.vlgmr.msra.gmra.mrb[32].mxu1 %vm341_vm5, %v1952_v52 }
0x12a1   :  { %2749 = vmatprep.mubr.msk.bf16.mxu1 %vm2941_vm0, %v2940_v3 }
0x136b   :  { %v1694_v56 = vpop.f32.mrb[28].mxu1 }
0x136c   :  { %v2708_v57 = vpop.f32.mrb[29].mxu1 }
0x136f   :  { %v1860_v31 = vpop.f32.mrb[30].mxu1 }
0x1370   :  { %v2718_v30 = vpop.f32.mrb[31].mxu1 }
0x1373   :  { %v2026_v33 = vpop.f32.mrb[32].mxu1 }
0x1374   :  { %v2800_v58 = vpack.i.bf16 %v2026_v33, %v1860_v31  ;;  %v2728_v59 = vpop.f32.mrb[33].mxu1 }
0x1376   :  { %2801 = vrot.lane.b32.xlu1 %v2800_v58, %s2943_s16 }
0x13e8   :  { %v2802_v60 = vpop.permute.xlu1 %2801 }
0x13e9   :  { %v2804_v61 = vunpack.i.h.bf16 %v2802_v60  ;;  %v2803_v62 = vunpack.i.l.bf16 %v2802_v60 }
0x13eb   :  { %v2039_v0 = vsel %vm69_vm3, %v1694_v56, %v2804_v61  ;;  %v2038_v2 = vsel %vm69_vm3, %v3323_v20, %v2803_v62  ;;  %v1270_v56 = vld [vmem:[%s3485_s7 + $0x14] ss:$0 sm:$0xff] }
0x13ec   :  { %v2040_v4 = vpack.c.bf16 %v2039_v0, %v2038_v2  ;;  %v1271_v0 = vld [vmem:[%s3485_s7 + $0x15] ss:$0 sm:$0xff] }
0x13ee   :  { %2738 = vmatmul.mubr.msk.bf16.vlgmr.msra.gmra.mrb[24].mxu0 %vm214_vm4, %v2040_v4 }
0x13ef   :  { %2769 = vmatprep.mubr.msk.bf16.mxu0 %vm2941_vm0, %v2940_v3  ;;  %2754 = vmatpush3.bf16.msra.mxu0 %v2855_v25 }
0x13f0   :  { %2755 = vmatprep.subr.bf16.mxu0 %v2940_v3 }
0x13f3   :  { %2756 = vmatpush3.bf16.msra.mxu0 %v2856_v28 }
0x13f4   :  { %2757 = vmatprep.subr.bf16.mxu0 %v2940_v3 }
0x13f7   :  { %2758 = vmatpush3.bf16.msra.mxu0 %v2857_v29 }
0x13f8   :  { %2759 = vmatprep.subr.bf16.mxu0 %v2940_v3 }
0x13fb   :  { %2760 = vmatpush3.bf16.msra.mxu0 %v2858_v32 }
0x13fc   :  { %2761 = vmatprep.subr.bf16.mxu0 %v2940_v3 }
0x13ff   :  { %2762 = vmatpush3.bf16.msra.mxu0 %v2859_v34  ;;  %v1272_v34 = vld [vmem:[%s3485_s7 + $0x16] ss:$0 sm:$0xff] }
0x1400   :  { %2763 = vmatprep.subr.bf16.mxu0 %v2940_v3 }
0x1403   :  { %2764 = vmatpush3.bf16.msra.mxu0 %v2860_v35 }
0x1404   :  { %2765 = vmatprep.subr.bf16.mxu0 %v2940_v3 }
0x1407   :  { %2766 = vmatpush3.bf16.msra.mxu0 %v2861_v54 }
0x1408   :  { %2767 = vmatprep.subr.bf16.mxu0 %v2940_v3 }
0x140b   :  { %2768 = vmatpush3.bf16.msra.mxu0 %v2862_v55 }
0x14c1   :  { %v2102_v6 = vpop.f32.mrb[24].mxu0 }
0x14c2   :  { %v2103_v63 = vadd.f32 %v2102_v6, %v1267_v5  ;;  %v2739_v7 = vpop.f32.mrb[25].mxu0 }
0x14c3   :  { %v2105_v8 = vpop.f32.mrb[26].mxu0 }
0x14c4   :  { %v2106_v9 = vadd.f32 %v2105_v8, %v1267_v5  ;;  %v2740_v10 = vpop.f32.mrb[27].mxu0  ;;  %v2109_v11 = vadd.f32 %v2103_v63, %v3265_v44 }
0x14c6   :  { %v2111_v12 = vsel %vm214_vm4, %v2109_v11, 0.0  ;;  %v2110_v13 = vadd.f32 %v2106_v9, %v3267_v45  ;;  %v2851_v45 = vld [vmem:[%s3483_s5 + $0x20] sm:$0xff]  }
0x14c7   :  { %2112 = vadd.xlane.f32.xlu0 %v2111_v12  ;;  %2742 = vmatpush3.bf16.msra.mxu1 %v2851_v45  ;;  %v2866_v45 = vld [vmem:[%s3486_s8 + $0x18] sm:$0xff]  }
0x14c8   :  { %v2114_v14 = vsel %vm214_vm4, %v2110_v13, 0.0  ;;  %2743 = vmatprep.subr.bf16.mxu1 %v2940_v3 }
0x14c9   :  { %2115 = vadd.xlane.f32.xlu1 %v2114_v14 }
0x14cb   :  { %2744 = vmatpush3.bf16.msra.mxu1 %v2852_v22 }
0x14cc   :  { %2745 = vmatprep.subr.bf16.mxu1 %v2940_v3 }
0x14cf   :  { %2746 = vmatpush3.bf16.msra.mxu1 %v2853_v23 }
0x14d0   :  { %2747 = vmatprep.subr.bf16.mxu1 %v2940_v3 }
0x14d3   :  { %2748 = vmatpush3.bf16.msra.mxu1 %v2854_v24 }
0x14d4   :  { %2773 = vmatprep.subr.bf16.mxu1 %v2940_v3 }
0x1554   :  { %v2113_v15 = vpop.xlane.xlu0 %2112 }
0x1555   :  { %v2117_v16 = vmul.f32 0.015625, %v2113_v15 }
0x1556   :  { %v2116_v17 = vpop.xlane.xlu1 %2115 }
0x1557   :  { %v2119_v26 = vsub.f32 %v2109_v11, %v2117_v16  ;;  %v2118_v27 = vmul.f32 0.015625, %v2116_v17 }
0x1559   :  { %v2120_v18 = vsub.f32 %v2110_v13, %v2118_v27  ;;  %v2121_v19 = vmul.f32 %v2119_v26, %v2119_v26 }
0x155b   :  { %v2123_v20 = vsel %vm214_vm4, %v2121_v19, 0.0  ;;  %v2122_v21 = vmul.f32 %v2120_v18, %v2120_v18 }
0x155c   :  { %2124 = vadd.xlane.f32.xlu0 %v2123_v20  ;;  %v2863_v20 = vld [vmem:[%s3486_s8] sm:$0xff]  }
0x155d   :  { %v2126_v44 = vsel %vm214_vm4, %v2122_v21, 0.0  ;;  %v2864_v21 = vld [vmem:[%s3486_s8 + $0x8] sm:$0xff]  }
0x1560   :  { %2127 = vadd.xlane.f32.xlu0 %v2126_v44  ;;  %v2865_v44 = vld [vmem:[%s3486_s8 + $0x10] sm:$0xff]  }
0x15e9   :  { %v2125_v36 = vpop.xlane.xlu0 %2124 }
0x15ea   :  { %v2129_v37 = vmul.f32 0.015625, %v2125_v36 }
0x15ec   :  { %v2131_v38 = vadd.f32 1e-05, %v2129_v37 }
0x15ed   :  { %v2128_v39 = vpop.xlane.xlu0 %2127 }
0x15ee   :  { %2907 = vrsqrt.f32 %v2131_v38  ;;  %v2130_v40 = vmul.f32 0.015625, %v2128_v39 }
0x15f0   :  { %v2132_v41 = vadd.f32 1e-05, %v2130_v40 }
0x15f2   :  { %2909 = vrsqrt.f32 %v2132_v41 }
0x15f8   :  { %v2908_v42 = vpop.eup %2907 }
0x15f9   :  { %v2135_v43 = vmul.f32 %v2908_v42, %v2119_v26 }
0x15fb   :  { %v2137_v48 = vmul.f32 %v2135_v43, %v1268_v46  ;;  %v2334_v43 = vld [vmem:[%s3485_s7 + $0x20] ss:$0 sm:$0xff] }
0x15fc   :  { %v2910_v47 = vpop.eup %2909 }
0x15fd   :  { %v2136_v49 = vmul.f32 %v2910_v47, %v2120_v18  ;;  %v2139_v52 = vadd.f32 %v2137_v48, %v1269_v50 }
0x15ff   :  { %v2138_v51 = vmul.f32 %v2136_v49, %v1268_v46 }
0x1601   :  { %v2140_v1 = vadd.f32 %v2138_v51, %v1269_v50 }
0x1603   :  { %v2141_v53 = vpack.c.bf16 %v2140_v1, %v2139_v52 }
0x1605   :  { %2750 = vmatmul.mubr.msk.bf16.vlgmr.msra.gmra.mrb[36].mxu1 %vm214_vm4, %v2141_v53 }
0x1606   :  { %2781 = vmatprep.mubr.msk.bf16.mxu1 %vm2941_vm0, %v2940_v3  ;;  %2774 = vmatpush3.bf16.msra.mxu1 %v2863_v20 }
0x1607   :  { %2775 = vmatprep.subr.bf16.mxu1 %v2940_v3 }
0x160a   :  { %2776 = vmatpush3.bf16.msra.mxu1 %v2864_v21 }
0x160b   :  { %2777 = vmatprep.subr.bf16.mxu1 %v2940_v3 }
0x160e   :  { %2778 = vmatpush3.bf16.msra.mxu1 %v2865_v44 }
0x160f   :  { %2779 = vmatprep.subr.bf16.mxu1 %v2940_v3  ;;  %v1273_v3 = vld [vmem:[%s3485_s7 + $0x17] ss:$0 sm:$0xff] }
0x1612   :  { %2780 = vmatpush3.bf16.msra.mxu1 %v2866_v45 }
0x16d8   :  { %v2203_v57 = vpop.f32.mrb[36].mxu1 }
0x16d9   :  { %v2204_v31 = vadd.f32 %v2203_v57, %v1270_v56  ;;  %v2751_v30 = vpop.f32.mrb[37].mxu1 }
0x16da   :  { %v2206_v33 = vpop.f32.mrb[38].mxu1 }
0x16db   :  { %v2207_v58 = vadd.f32 %v2206_v33, %v1270_v56  ;;  %v2752_v59 = vpop.f32.mrb[39].mxu1  ;;  %v2210_v60 = vmax.f32 %v2204_v31, 0.0 }
0x16dd   :  { %v2211_v61 = vmax.f32 %v2207_v58, 0.0 }
0x16df   :  { %v2212_v62 = vpack.c.bf16 %v2211_v61, %v2210_v60 }
0x16e1   :  { %2770 = vmatmul.mubr.bf16.vlgmr.msra.gmra.mrb[28].mxu0 %v2212_v62 }
0x17b4   :  { %v2295_v2 = vpop.f32.mrb[28].mxu0 }
0x17b5   :  { %v2296_v4 = vadd.f32 %v2295_v2, %v1271_v0  ;;  %v2771_v5 = vpop.f32.mrb[29].mxu0 }
0x17b6   :  { %v2298_v6 = vpop.f32.mrb[30].mxu0 }
0x17b7   :  { %v2299_v63 = vadd.f32 %v2298_v6, %v1271_v0  ;;  %v2772_v7 = vpop.f32.mrb[31].mxu0  ;;  %v2302_v8 = vadd.f32 %v2296_v4, %v2139_v52 }
0x17b9   :  { %v2304_v9 = vsel %vm214_vm4, %v2302_v8, 0.0  ;;  %v2303_v10 = vadd.f32 %v2299_v63, %v2140_v1 }
0x17ba   :  { %2305 = vadd.xlane.f32.xlu1 %v2304_v9 }
0x17bb   :  { %v2307_v11 = vsel %vm214_vm4, %v2303_v10, 0.0 }
0x17bc   :  { %2308 = vadd.xlane.f32.xlu0 %v2307_v11 }
0x1847   :  { %v2306_v12 = vpop.xlane.xlu1 %2305 }
0x1848   :  { %v2310_v13 = vmul.f32 0.015625, %v2306_v12 }
0x1849   :  { %v2309_v14 = vpop.xlane.xlu0 %2308 }
0x184a   :  { %v2312_v15 = vsub.f32 %v2302_v8, %v2310_v13  ;;  %v2311_v16 = vmul.f32 0.015625, %v2309_v14 }
0x184c   :  { %v2313_v17 = vsub.f32 %v2303_v10, %v2311_v16  ;;  %v2314_v26 = vmul.f32 %v2312_v15, %v2312_v15 }
0x184e   :  { %v2316_v27 = vsel %vm214_vm4, %v2314_v26, 0.0  ;;  %v2315_v18 = vmul.f32 %v2313_v17, %v2313_v17 }
0x184f   :  { %2317 = vadd.xlane.f32.xlu1 %v2316_v27 }
0x1850   :  { %v2319_v19 = vsel %vm214_vm4, %v2315_v18, 0.0 }
0x1851   :  { %2320 = vadd.xlane.f32.xlu0 %v2319_v19 }
0x18dc   :  { %v2318_v22 = vpop.xlane.xlu1 %2317 }
0x18dd   :  { %v2322_v23 = vmul.f32 0.015625, %v2318_v22 }
0x18de   :  { %v2321_v24 = vpop.xlane.xlu0 %2320 }
0x18df   :  { %v2324_v25 = vadd.f32 1e-05, %v2322_v23  ;;  %v2323_v28 = vmul.f32 0.015625, %v2321_v24 }
0x18e1   :  { %2911 = vrsqrt.f32 %v2324_v25  ;;  %v2325_v29 = vadd.f32 1e-05, %v2323_v28 }
0x18e3   :  { %2913 = vrsqrt.f32 %v2325_v29 }
0x18eb   :  { %v2912_v32 = vpop.eup %2911 }
0x18ec   :  { %v2328_v35 = vmul.f32 %v2912_v32, %v2312_v15 }
0x18ed   :  { %v2914_v36 = vpop.eup %2913 }
0x18ee   :  { %v2330_v37 = vmul.f32 %v2328_v35, %v1272_v34  ;;  %v2329_v38 = vmul.f32 %v2914_v36, %v2313_v17 }
0x18f0   :  { %v2331_v39 = vmul.f32 %v2329_v38, %v1272_v34  ;;  %v2332_v40 = vadd.f32 %v2330_v37, %v1273_v3 }
0x18f2   :  { %v2333_v41 = vadd.f32 %v2331_v39, %v1273_v3 }
0x18f4   :  { %v2335_v42 = vpack.c.bf16 %v2333_v41, %v2332_v40 }
0x18f6   :  { %2782 = vmatmul.mubr.msk.bf16.vlgmr.msra.gmra.mrb[40].mxu1 %vm214_vm4, %v2335_v42 }
0x19c9   :  { %v2405_v46 = vpop.f32.mrb[40].mxu1 }
0x19ca   :  { %v2406_v47 = vadd.f32 %v2405_v46, %v2334_v43  ;;  %v2783_v48 = vpop.f32.mrb[41].mxu1 }
0x19cb   :  { %v2408_v49 = vpop.f32.mrb[42].mxu1 }
0x19cc   :  { %2412 = vst [vmem:[#allocation2] sm:$0xff] %v2406_v47  ;;  %v2409_v50 = vadd.f32 %v2408_v49, %v2334_v43  ;;  %v2784_v51 = vpop.f32.mrb[43].mxu1 }
0x19ce   :  { %2413 = vst [vmem:[#allocation2 + $0x8] sm:$0xff] %v2409_v50 }
0x19cf   :  { %2926 = shalt.err (!%p2923_p4)
}
0x19d0   :  { %s2927_s18 = scalar_lea.hbm %s3487_s9, 256 }
0x19d1   :  { %p2928_p5 = scmp.ne.s32.totalorder %s3487_s9, %s2927_s18  ;;  %p2931_p6 = scmp.lt.u32.totalorder %s2927_s18, %s3487_s9 }
0x19d3   :  { %p2933_p7 = pnand %p2931_p6, %p2928_p5 }
0x19d5   :  { %2936 = shalt.err (!%p2933_p7)
}
0x19d6   :  { %s2946_s22 = smov 128   ;;  %s2947_s16 = smov 8  }
0x19d7   :  { %2425 = dma.vmem_to_hbm [thread:$0]  %s2420_s0, 256, %s3487_s9, [#allocation3], %s2946_s22, %s2946_s22, %s2947_s16  }
0x19d8   :  { %2937 = dma.done.wait [#allocation3], 256  }
0x19d9   :  { %2938 = vsyncadd [#allocation3], 4294967040 }
0x19da   :  { %2429 = vsyncpa [#allocation3], 1 }

</bundles_post_ra>
